<compile_context>
chip_gen: v7x
topology: tpu7x:2x2x1
jax: 0.10.0
libtpu: 0.0.40
codegen_flags: <defaults>
</compile_context>

<pallas_src>
import jax
import jax.numpy as jnp
import numpy as np
from jax.experimental import pallas as pl
from jax.experimental.pallas import tpu as pltpu

# ----------------------------- configuration -----------------------------
INPUT_SIZE = 4
HIDDEN_SIZE = 32
NUM_LAYERS = 2
OUTPUT_SIZE = 4
DROPOUT = 0.0          # eval-mode forward; see note above
LEARNING_RATE = 1e-3   # unused in forward
BATCH = 2
SEQ = 8


# ----------------------------- fused Pallas kernel -----------------------------
def _make_fused_kernel(num_layers, seq, batch, hidden):
    """All LSTM layers (wavefront-packed) + FC head in one invocation."""
    L, T, B, H = num_layers, seq, batch, hidden
    G = 4 * H

    def kernel(*refs):
        # ---- parse refs: inputs, outputs, scratch ----
        x_ref, h0_ref, c0_ref, wih0_ref, b0_ref, wblk_ref = refs[:6]
        idx = 6
        if L > 1:
            bhi_ref = refs[idx]
            idx += 1
        wfc_ref, bfc_ref = refs[idx:idx + 2]
        idx += 2
        out_ref, hN_ref, cN_ref = refs[idx:idx + 3]
        y_sc = refs[idx + 3]                       # VMEM (T, B, H) f32

        # ---- hoisted layer-0 input projection: all timesteps in ONE matmul ----
        # x_ref is pre-flattened time-major (T*B, D); row t*B + b.
        gx0 = (jnp.dot(x_ref[...], wih0_ref[...],
                       preferred_element_type=jnp.float32) + b0_ref[...])

        wblk = wblk_ref[...]                       # (L*H, L*4H), loaded once
        if L > 1:
            bhi = bhi_ref[...]                     # (1, (L-1)*4H)

        h = [h0_ref[l].astype(jnp.float32) for l in range(L)]   # (B, H) each
        c = [c0_ref[l].astype(jnp.float32) for l in range(L)]

        # ---- wavefront recurrence: step s advances layer l at time t = s - l.
        #      T and L are static, so this is a fully unrolled in-kernel loop
        #      with static indices everywhere. Chain length T+L-1, not T*L. ----
        for s in range(T + L - 1):
            lhs = jnp.concatenate(h, axis=1) if L > 1 else h[0]      # (B, L*H)
            blk = jnp.dot(lhs, wblk,
                          preferred_element_type=jnp.float32)        # (B, L*4H)
            for l in range(L):
                t = s - l
                if not (0 <= t < T):
                    continue                       # layer inactive this step
                # column block l: h_l @ W_hh_l  (+ h_{l-1} @ W_ih_l for l>0)
                g_lin = blk[:, l * G:(l + 1) * G]
                if l == 0:
                    g_lin = g_lin + gx0[t * B:(t + 1) * B, :]
                else:
                    g_lin = g_lin + bhi[:, (l - 1) * G:l * G]
                # Full-width transcendentals on the (B, 4H=128) vreg (EUP slot),
                # then static lane slices for the individual gates.
                sig = jax.nn.sigmoid(g_lin)
                tah = jnp.tanh(g_lin)
                i_g = sig[:, 0 * H:1 * H]
                f_g = sig[:, 1 * H:2 * H]
                g_g = tah[:, 2 * H:3 * H]
                o_g = sig[:, 3 * H:4 * H]
                c[l] = f_g * c[l] + i_g * g_g
                h[l] = o_g * jnp.tanh(c[l])
                if l == L - 1:
                    y_sc[t] = h[l]                 # stays in VMEM

        # final states: written exactly once per layer
        for l in range(L):
            hN_ref[l] = h[l].astype(hN_ref.dtype)
            cN_ref[l] = c[l].astype(cN_ref.dtype)

        # ---- FC epilogue: batch-major rows (b*T + t), one matmul, one store ----
        y = y_sc[...]                              # (T, B, H)
        if B > 1:
            y_bt = jnp.concatenate(
                [jax.lax.index_in_dim(y, b, axis=1, keepdims=False)
                 for b in range(B)], axis=0)       # (B*T, H), rows b*T + t
        else:
            y_bt = jax.lax.index_in_dim(y, 0, axis=1, keepdims=False)
        out = (jnp.dot(y_bt, wfc_ref[...], preferred_element_type=jnp.float32)
               + bfc_ref[...])
        out_ref[...] = out.astype(out_ref.dtype)   # single full contiguous store

    return kernel


def _full_spec(shape):
    n = len(shape)
    return pl.BlockSpec(shape, lambda i, n=n: (0,) * n)


# ----------------------------- wrapper -----------------------------
@jax.jit
def lstm_forward(x, hidden, params):
    """Matches LSTM.forward: returns (out[(B*T, O)], (h_n, c_n))."""
    h0, c0 = hidden                                # (L, B, H) each
    B, T, D = x.shape
    L, _, H = h0.shape
    O = params["fc_w_t"].shape[-1]
    G = 4 * H

    # ---- layout / packing work done in the wrapper (free HBM-side ops) ----
    # time-major flattened x: row t*B + b
    x_tm = jnp.transpose(x, (1, 0, 2)).reshape(T * B, D)

    wih0_t, _, b0 = params["lstm"][0]
    # block RHS: [[W_hh0, W_ih1], [0, W_hh1]]  (general L: superdiagonal W_ih)
    wblk = jnp.zeros((L * H, L * G), jnp.float32)
    for l in range(L):
        whh_t_l = params["lstm"][l][1]
        wblk = wblk.at[l * H:(l + 1) * H, l * G:(l + 1) * G].set(whh_t_l)
        if l + 1 < L:
            wih_t_next = params["lstm"][l + 1][0]
            wblk = wblk.at[l * H:(l + 1) * H, (l + 1) * G:(l + 2) * G].set(wih_t_next)

    inputs = [x_tm, h0, c0, wih0_t, b0, wblk]
    if L > 1:
        bhi = jnp.concatenate([params["lstm"][l][2] for l in range(1, L)], axis=1)
        inputs.append(bhi)
    inputs += [params["fc_w_t"], params["fc_b"]]
    in_specs = [_full_spec(a.shape) for a in inputs]

    out_shape = (
        jax.ShapeDtypeStruct((B * T, O), jnp.float32),
        jax.ShapeDtypeStruct((L, B, H), jnp.float32),
        jax.ShapeDtypeStruct((L, B, H), jnp.float32),
    )
    out_specs = [
        _full_spec((B * T, O)),
        _full_spec((L, B, H)),
        _full_spec((L, B, H)),
    ]

    out, h_n, c_n = pl.pallas_call(
        _make_fused_kernel(L, T, B, H),
        out_shape=out_shape,
        grid_spec=pltpu.PrefetchScalarGridSpec(
            num_scalar_prefetch=0,
            grid=(1,),
            in_specs=in_specs,
            out_specs=out_specs,
            scratch_shapes=[pltpu.VMEM((T, B, H), jnp.float32)],
        ),
        compiler_params=pltpu.CompilerParams(
            dimension_semantics=("arbitrary",),
            vmem_limit_bytes=32 * 1024 * 1024),   # explicit: v7x has 64 MiB physical
    )(*inputs)
    return out, (h_n, c_n)


# ----------------------------- params & reference -----------------------------
def init_params(key):
    k = 1.0 / np.sqrt(HIDDEN_SIZE)
    params = {"lstm": []}
    for l in range(NUM_LAYERS):
        in_l = INPUT_SIZE if l == 0 else HIDDEN_SIZE
        key, k1, k2, k3, k4 = jax.random.split(key, 5)
        w_ih = jax.random.uniform(k1, (4 * HIDDEN_SIZE, in_l), jnp.float32, -k, k)
        w_hh = jax.random.uniform(k2, (4 * HIDDEN_SIZE, HIDDEN_SIZE), jnp.float32, -k, k)
        b_ih = jax.random.uniform(k3, (4 * HIDDEN_SIZE,), jnp.float32, -k, k)
        b_hh = jax.random.uniform(k4, (4 * HIDDEN_SIZE,), jnp.float32, -k, k)
        params["lstm"].append(
            (w_ih.T, w_hh.T, (b_ih + b_hh).reshape(1, 4 * HIDDEN_SIZE)))
    key, k5, k6 = jax.random.split(key, 3)
    kf = 1.0 / np.sqrt(HIDDEN_SIZE)
    w_fc = jax.random.uniform(k5, (OUTPUT_SIZE, HIDDEN_SIZE), jnp.float32, -kf, kf)
    b_fc = jax.random.uniform(k6, (OUTPUT_SIZE,), jnp.float32, -kf, kf)
    params["fc_w_t"] = w_fc.T
    params["fc_b"] = b_fc.reshape(1, OUTPUT_SIZE)
    return params


def ref_forward(x, hidden, params):
    """Plain-JAX reference matching PyTorch nn.LSTM + Linear semantics."""
    h0, c0 = hidden
    B, T, _ = x.shape
    H = HIDDEN_SIZE
    layer_in = x
    hs, cs = [], []
    for l, (wih_t, whh_t, b) in enumerate(params["lstm"]):
        def step(carry, xt, wih_t=wih_t, whh_t=whh_t, b=b):
            h, c = carry
            gates = xt @ wih_t + h @ whh_t + b[0]
            i = jax.nn.sigmoid(gates[:, 0 * H:1 * H])
            f = jax.nn.sigmoid(gates[:, 1 * H:2 * H])
            g = jnp.tanh(gates[:, 2 * H:3 * H])
            o = jax.nn.sigmoid(gates[:, 3 * H:4 * H])
            c = f * c + i * g
            h = o * jnp.tanh(c)
            return (h, c), h
        (hN, cN), ys = jax.lax.scan(step, (h0[l], c0[l]),
                                    jnp.transpose(layer_in, (1, 0, 2)))
        layer_in = jnp.transpose(ys, (1, 0, 2))
        hs.append(hN)
        cs.append(cN)
    out = layer_in.reshape(B * T, H) @ params["fc_w_t"] + params["fc_b"][0]
    return out, (jnp.stack(hs), jnp.stack(cs))


# ----------------------------- main -----------------------------
if __name__ == "__main__":
    key = jax.random.PRNGKey(0)
    key, kx, kp = jax.random.split(key, 3)

    x = jax.random.normal(kx, (BATCH, SEQ, INPUT_SIZE), jnp.float32)
    # init_hidden equivalent: zeros of shape (num_layers, batch, hidden)
    hidden = (jnp.zeros((NUM_LAYERS, BATCH, HIDDEN_SIZE), jnp.float32),
              jnp.zeros((NUM_LAYERS, BATCH, HIDDEN_SIZE), jnp.float32))
    params = init_params(kp)

    out, (h_n, c_n) = lstm_forward(x, hidden, params)
    jax.block_until_ready((out, h_n, c_n))

    out_ref, (h_ref, c_ref) = ref_forward(x, hidden, params)
    np.testing.assert_allclose(np.asarray(out), np.asarray(out_ref),
                               rtol=2e-5, atol=2e-5)
    np.testing.assert_allclose(np.asarray(h_n), np.asarray(h_ref),
                               rtol=2e-5, atol=2e-5)
    np.testing.assert_allclose(np.asarray(c_n), np.asarray(c_ref),
                               rtol=2e-5, atol=2e-5)

    assert out.shape == (BATCH * SEQ, OUTPUT_SIZE)
    assert h_n.shape == (NUM_LAYERS, BATCH, HIDDEN_SIZE)
    assert c_n.shape == (NUM_LAYERS, BATCH, HIDDEN_SIZE)
    print("KERNEL_OK")
</pallas_src>

<mosaic_0001>
module attributes {stable_mosaic.version = 11 : i64} {
  func.func @kernel(%arg0: i32, %arg1: memref<16x4xf32, #tpu.memory_space<vmem>>, %arg2: memref<2x2x32xf32, #tpu.memory_space<vmem>>, %arg3: memref<2x2x32xf32, #tpu.memory_space<vmem>>, %arg4: memref<4x128xf32, #tpu.memory_space<vmem>>, %arg5: memref<1x128xf32, #tpu.memory_space<vmem>>, %arg6: memref<64x256xf32, #tpu.memory_space<vmem>>, %arg7: memref<1x128xf32, #tpu.memory_space<vmem>>, %arg8: memref<32x4xf32, #tpu.memory_space<vmem>>, %arg9: memref<1x4xf32, #tpu.memory_space<vmem>>, %arg10: memref<16x4xf32, #tpu.memory_space<vmem>>, %arg11: memref<2x2x32xf32, #tpu.memory_space<vmem>>, %arg12: memref<2x2x32xf32, #tpu.memory_space<vmem>>, %arg13: memref<8x2x32xf32, #tpu.memory_space<vmem>>) attributes {dimension_semantics = [#tpu.dimension_semantics<arbitrary>], iteration_bounds = array<i64: 1>, scalar_prefetch = 0 : i64, scratch_operands = 1 : i64, tpu.core_type = #tpu.core_type<tc>, window_params = [{pipeline_mode = #tpu.pipeline_mode<synchronous>, transform_indices = @transform_0, window_bounds = array<i64: 16, 4>}, {pipeline_mode = #tpu.pipeline_mode<synchronous>, transform_indices = @transform_1, window_bounds = array<i64: 2, 2, 32>}, {pipeline_mode = #tpu.pipeline_mode<synchronous>, transform_indices = @transform_2, window_bounds = array<i64: 2, 2, 32>}, {pipeline_mode = #tpu.pipeline_mode<synchronous>, transform_indices = @transform_3, window_bounds = array<i64: 4, 128>}, {pipeline_mode = #tpu.pipeline_mode<synchronous>, transform_indices = @transform_4, window_bounds = array<i64: 1, 128>}, {pipeline_mode = #tpu.pipeline_mode<synchronous>, transform_indices = @transform_5, window_bounds = array<i64: 64, 256>}, {pipeline_mode = #tpu.pipeline_mode<synchronous>, transform_indices = @transform_6, window_bounds = array<i64: 1, 128>}, {pipeline_mode = #tpu.pipeline_mode<synchronous>, transform_indices = @transform_7, window_bounds = array<i64: 32, 4>}, {pipeline_mode = #tpu.pipeline_mode<synchronous>, transform_indices = @transform_8, window_bounds = array<i64: 1, 4>}, {pipeline_mode = #tpu.pipeline_mode<synchronous>, transform_indices = @transform_9, window_bounds = array<i64: 16, 4>}, {pipeline_mode = #tpu.pipeline_mode<synchronous>, transform_indices = @transform_10, window_bounds = array<i64: 2, 2, 32>}, {pipeline_mode = #tpu.pipeline_mode<synchronous>, transform_indices = @transform_11, window_bounds = array<i64: 2, 2, 32>}]} {
    %c0 = arith.constant 0 : index
    %c0_0 = arith.constant 0 : index
    %0 = vector.load %arg1[%c0, %c0_0] : memref<16x4xf32, #tpu.memory_space<vmem>>, vector<16x4xf32>
    %c0_1 = arith.constant 0 : index
    %c0_2 = arith.constant 0 : index
    %1 = vector.load %arg4[%c0_1, %c0_2] : memref<4x128xf32, #tpu.memory_space<vmem>>, vector<4x128xf32>
    %cst = arith.constant dense<0.000000e+00> : vector<16x128xf32>
    %2 = tpu.matmul %0, %1, %cst {dimension_numbers = #tpu.dot_dimension_numbers<[1], [0], [0], [1], [0, 0, 1, 1], [], []>} : vector<16x4xf32>, vector<4x128xf32>, vector<16x128xf32> -> vector<16x128xf32>
    %c0_3 = arith.constant 0 : index
    %c0_4 = arith.constant 0 : index
    %3 = vector.load %arg5[%c0_3, %c0_4] : memref<1x128xf32, #tpu.memory_space<vmem>>, vector<1x128xf32>
    %4 = vector.broadcast %3 : vector<1x128xf32> to vector<16x128xf32>
    %5 = arith.addf %2, %4 : vector<16x128xf32>
    %c0_5 = arith.constant 0 : index
    %c0_6 = arith.constant 0 : index
    %6 = vector.load %arg6[%c0_5, %c0_6] : memref<64x256xf32, #tpu.memory_space<vmem>>, vector<64x256xf32>
    %c0_7 = arith.constant 0 : index
    %c0_8 = arith.constant 0 : index
    %7 = vector.load %arg7[%c0_7, %c0_8] : memref<1x128xf32, #tpu.memory_space<vmem>>, vector<1x128xf32>
    %c0_9 = arith.constant 0 : index
    %c0_10 = arith.constant 0 : index
    %c0_11 = arith.constant 0 : index
    %8 = vector.load %arg2[%c0_9, %c0_10, %c0_11] : memref<2x2x32xf32, #tpu.memory_space<vmem>>, vector<1x2x32xf32>
    %9 = vector.shape_cast %8 : vector<1x2x32xf32> to vector<2x32xf32>
    %c1 = arith.constant 1 : index
    %c0_12 = arith.constant 0 : index
    %c0_13 = arith.constant 0 : index
    %10 = vector.load %arg2[%c1, %c0_12, %c0_13] : memref<2x2x32xf32, #tpu.memory_space<vmem>>, vector<1x2x32xf32>
    %11 = vector.shape_cast %10 : vector<1x2x32xf32> to vector<2x32xf32>
    %c0_14 = arith.constant 0 : index
    %c0_15 = arith.constant 0 : index
    %c0_16 = arith.constant 0 : index
    %12 = vector.load %arg3[%c0_14, %c0_15, %c0_16] : memref<2x2x32xf32, #tpu.memory_space<vmem>>, vector<1x2x32xf32>
    %13 = vector.shape_cast %12 : vector<1x2x32xf32> to vector<2x32xf32>
    %c1_17 = arith.constant 1 : index
    %c0_18 = arith.constant 0 : index
    %c0_19 = arith.constant 0 : index
    %14 = vector.load %arg3[%c1_17, %c0_18, %c0_19] : memref<2x2x32xf32, #tpu.memory_space<vmem>>, vector<1x2x32xf32>
    %15 = vector.shape_cast %14 : vector<1x2x32xf32> to vector<2x32xf32>
    %16 = tpu.concatenate %9, %11 in 1 : vector<2x32xf32>, vector<2x32xf32> -> vector<2x64xf32>
    %cst_20 = arith.constant dense<0.000000e+00> : vector<2x256xf32>
    %17 = tpu.matmul %16, %6, %cst_20 {dimension_numbers = #tpu.dot_dimension_numbers<[1], [0], [0], [1], [0, 0, 1, 1], [], []>} : vector<2x64xf32>, vector<64x256xf32>, vector<2x256xf32> -> vector<2x256xf32>
    %18 = vector.extract_strided_slice %17 {offsets = [0, 0], sizes = [2, 128], strides = [1, 1]} : vector<2x256xf32> to vector<2x128xf32>
    %19 = vector.extract_strided_slice %5 {offsets = [0, 0], sizes = [2, 128], strides = [1, 1]} : vector<16x128xf32> to vector<2x128xf32>
    %20 = arith.addf %18, %19 : vector<2x128xf32>
    %21 = arith.negf %20 : vector<2x128xf32>
    %22 = math.exp %21 : vector<2x128xf32>
    %cst_21 = arith.constant 1.000000e+00 : f32
    %23 = vector.broadcast %cst_21 : f32 to vector<2x128xf32>
    %24 = arith.addf %23, %22 : vector<2x128xf32>
    %25 = arith.divf %23, %24 : vector<2x128xf32>
    %26 = math.tanh %20 : vector<2x128xf32>
    %27 = vector.extract_strided_slice %25 {offsets = [0, 0], sizes = [2, 32], strides = [1, 1]} : vector<2x128xf32> to vector<2x32xf32>
    %28 = vector.extract_strided_slice %25 {offsets = [0, 32], sizes = [2, 32], strides = [1, 1]} : vector<2x128xf32> to vector<2x32xf32>
    %29 = vector.extract_strided_slice %26 {offsets = [0, 64], sizes = [2, 32], strides = [1, 1]} : vector<2x128xf32> to vector<2x32xf32>
    %30 = vector.extract_strided_slice %25 {offsets = [0, 96], sizes = [2, 32], strides = [1, 1]} : vector<2x128xf32> to vector<2x32xf32>
    %31 = arith.mulf %28, %13 : vector<2x32xf32>
    %32 = arith.mulf %27, %29 : vector<2x32xf32>
    %33 = arith.addf %31, %32 : vector<2x32xf32>
    %34 = math.tanh %33 : vector<2x32xf32>
    %35 = arith.mulf %30, %34 : vector<2x32xf32>
    %36 = tpu.concatenate %35, %11 in 1 : vector<2x32xf32>, vector<2x32xf32> -> vector<2x64xf32>
    %cst_22 = arith.constant dense<0.000000e+00> : vector<2x256xf32>
    %37 = tpu.matmul %36, %6, %cst_22 {dimension_numbers = #tpu.dot_dimension_numbers<[1], [0], [0], [1], [0, 0, 1, 1], [], []>} : vector<2x64xf32>, vector<64x256xf32>, vector<2x256xf32> -> vector<2x256xf32>
    %38 = vector.extract_strided_slice %37 {offsets = [0, 0], sizes = [2, 128], strides = [1, 1]} : vector<2x256xf32> to vector<2x128xf32>
    %39 = vector.extract_strided_slice %5 {offsets = [2, 0], sizes = [2, 128], strides = [1, 1]} : vector<16x128xf32> to vector<2x128xf32>
    %40 = arith.addf %38, %39 : vector<2x128xf32>
    %41 = arith.negf %40 : vector<2x128xf32>
    %42 = math.exp %41 : vector<2x128xf32>
    %cst_23 = arith.constant 1.000000e+00 : f32
    %43 = vector.broadcast %cst_23 : f32 to vector<2x128xf32>
    %44 = arith.addf %43, %42 : vector<2x128xf32>
    %45 = arith.divf %43, %44 : vector<2x128xf32>
    %46 = math.tanh %40 : vector<2x128xf32>
    %47 = vector.extract_strided_slice %45 {offsets = [0, 0], sizes = [2, 32], strides = [1, 1]} : vector<2x128xf32> to vector<2x32xf32>
    %48 = vector.extract_strided_slice %45 {offsets = [0, 32], sizes = [2, 32], strides = [1, 1]} : vector<2x128xf32> to vector<2x32xf32>
    %49 = vector.extract_strided_slice %46 {offsets = [0, 64], sizes = [2, 32], strides = [1, 1]} : vector<2x128xf32> to vector<2x32xf32>
    %50 = vector.extract_strided_slice %45 {offsets = [0, 96], sizes = [2, 32], strides = [1, 1]} : vector<2x128xf32> to vector<2x32xf32>
    %51 = arith.mulf %48, %33 : vector<2x32xf32>
    %52 = arith.mulf %47, %49 : vector<2x32xf32>
    %53 = arith.addf %51, %52 : vector<2x32xf32>
    %54 = math.tanh %53 : vector<2x32xf32>
    %55 = arith.mulf %50, %54 : vector<2x32xf32>
    %56 = vector.extract_strided_slice %37 {offsets = [0, 128], sizes = [2, 128], strides = [1, 1]} : vector<2x256xf32> to vector<2x128xf32>
    %57 = vector.broadcast %7 : vector<1x128xf32> to vector<2x128xf32>
    %58 = arith.addf %56, %57 : vector<2x128xf32>
    %59 = arith.negf %58 : vector<2x128xf32>
    %60 = math.exp %59 : vector<2x128xf32>
    %cst_24 = arith.constant 1.000000e+00 : f32
    %61 = vector.broadcast %cst_24 : f32 to vector<2x128xf32>
    %62 = arith.addf %61, %60 : vector<2x128xf32>
    %63 = arith.divf %61, %62 : vector<2x128xf32>
    %64 = math.tanh %58 : vector<2x128xf32>
    %65 = vector.extract_strided_slice %63 {offsets = [0, 0], sizes = [2, 32], strides = [1, 1]} : vector<2x128xf32> to vector<2x32xf32>
    %66 = vector.extract_strided_slice %63 {offsets = [0, 32], sizes = [2, 32], strides = [1, 1]} : vector<2x128xf32> to vector<2x32xf32>
    %67 = vector.extract_strided_slice %64 {offsets = [0, 64], sizes = [2, 32], strides = [1, 1]} : vector<2x128xf32> to vector<2x32xf32>
    %68 = vector.extract_strided_slice %63 {offsets = [0, 96], sizes = [2, 32], strides = [1, 1]} : vector<2x128xf32> to vector<2x32xf32>
    %69 = arith.mulf %66, %15 : vector<2x32xf32>
    %70 = arith.mulf %65, %67 : vector<2x32xf32>
    %71 = arith.addf %69, %70 : vector<2x32xf32>
    %72 = math.tanh %71 : vector<2x32xf32>
    %73 = arith.mulf %68, %72 : vector<2x32xf32>
    %c0_25 = arith.constant 0 : index
    %c0_26 = arith.constant 0 : index
    %c0_27 = arith.constant 0 : index
    %74 = vector.load %arg13[%c0_25, %c0_26, %c0_27] : memref<8x2x32xf32, #tpu.memory_space<vmem>>, vector<1x2x32xf32>
    %75 = vector.shape_cast %74 : vector<1x2x32xf32> to vector<2x32xf32>
    %76 = vector.shape_cast %73 : vector<2x32xf32> to vector<1x2x32xf32>
    tpu.vector_store %arg13[%c0_25, %c0_26, %c0_27], %76 {strides = array<i32>} : memref<8x2x32xf32, #tpu.memory_space<vmem>>, vector<1x2x32xf32>,
    %77 = tpu.concatenate %55, %73 in 1 : vector<2x32xf32>, vector<2x32xf32> -> vector<2x64xf32>
    %cst_28 = arith.constant dense<0.000000e+00> : vector<2x256xf32>
    %78 = tpu.matmul %77, %6, %cst_28 {dimension_numbers = #tpu.dot_dimension_numbers<[1], [0], [0], [1], [0, 0, 1, 1], [], []>} : vector<2x64xf32>, vector<64x256xf32>, vector<2x256xf32> -> vector<2x256xf32>
    %79 = vector.extract_strided_slice %78 {offsets = [0, 0], sizes = [2, 128], strides = [1, 1]} : vector<2x256xf32> to vector<2x128xf32>
    %80 = vector.extract_strided_slice %5 {offsets = [4, 0], sizes = [2, 128], strides = [1, 1]} : vector<16x128xf32> to vector<2x128xf32>
    %81 = arith.addf %79, %80 : vector<2x128xf32>
    %82 = arith.negf %81 : vector<2x128xf32>
    %83 = math.exp %82 : vector<2x128xf32>
    %cst_29 = arith.constant 1.000000e+00 : f32
    %84 = vector.broadcast %cst_29 : f32 to vector<2x128xf32>
    %85 = arith.addf %84, %83 : vector<2x128xf32>
    %86 = arith.divf %84, %85 : vector<2x128xf32>
    %87 = math.tanh %81 : vector<2x128xf32>
    %88 = vector.extract_strided_slice %86 {offsets = [0, 0], sizes = [2, 32], strides = [1, 1]} : vector<2x128xf32> to vector<2x32xf32>
    %89 = vector.extract_strided_slice %86 {offsets = [0, 32], sizes = [2, 32], strides = [1, 1]} : vector<2x128xf32> to vector<2x32xf32>
    %90 = vector.extract_strided_slice %87 {offsets = [0, 64], sizes = [2, 32], strides = [1, 1]} : vector<2x128xf32> to vector<2x32xf32>
    %91 = vector.extract_strided_slice %86 {offsets = [0, 96], sizes = [2, 32], strides = [1, 1]} : vector<2x128xf32> to vector<2x32xf32>
    %92 = arith.mulf %89, %53 : vector<2x32xf32>
    %93 = arith.mulf %88, %90 : vector<2x32xf32>
    %94 = arith.addf %92, %93 : vector<2x32xf32>
    %95 = math.tanh %94 : vector<2x32xf32>
    %96 = arith.mulf %91, %95 : vector<2x32xf32>
    %97 = vector.extract_strided_slice %78 {offsets = [0, 128], sizes = [2, 128], strides = [1, 1]} : vector<2x256xf32> to vector<2x128xf32>
    %98 = vector.broadcast %7 : vector<1x128xf32> to vector<2x128xf32>
    %99 = arith.addf %97, %98 : vector<2x128xf32>
    %100 = arith.negf %99 : vector<2x128xf32>
    %101 = math.exp %100 : vector<2x128xf32>
    %cst_30 = arith.constant 1.000000e+00 : f32
    %102 = vector.broadcast %cst_30 : f32 to vector<2x128xf32>
    %103 = arith.addf %102, %101 : vector<2x128xf32>
    %104 = arith.divf %102, %103 : vector<2x128xf32>
    %105 = math.tanh %99 : vector<2x128xf32>
    %106 = vector.extract_strided_slice %104 {offsets = [0, 0], sizes = [2, 32], strides = [1, 1]} : vector<2x128xf32> to vector<2x32xf32>
    %107 = vector.extract_strided_slice %104 {offsets = [0, 32], sizes = [2, 32], strides = [1, 1]} : vector<2x128xf32> to vector<2x32xf32>
    %108 = vector.extract_strided_slice %105 {offsets = [0, 64], sizes = [2, 32], strides = [1, 1]} : vector<2x128xf32> to vector<2x32xf32>
    %109 = vector.extract_strided_slice %104 {offsets = [0, 96], sizes = [2, 32], strides = [1, 1]} : vector<2x128xf32> to vector<2x32xf32>
    %110 = arith.mulf %107, %71 : vector<2x32xf32>
    %111 = arith.mulf %106, %108 : vector<2x32xf32>
    %112 = arith.addf %110, %111 : vector<2x32xf32>
    %113 = math.tanh %112 : vector<2x32xf32>
    %114 = arith.mulf %109, %113 : vector<2x32xf32>
    %c1_31 = arith.constant 1 : index
    %c0_32 = arith.constant 0 : index
    %c0_33 = arith.constant 0 : index
    %115 = vector.load %arg13[%c1_31, %c0_32, %c0_33] : memref<8x2x32xf32, #tpu.memory_space<vmem>>, vector<1x2x32xf32>
    %116 = vector.shape_cast %115 : vector<1x2x32xf32> to vector<2x32xf32>
    %117 = vector.shape_cast %114 : vector<2x32xf32> to vector<1x2x32xf32>
    tpu.vector_store %arg13[%c1_31, %c0_32, %c0_33], %117 {strides = array<i32>} : memref<8x2x32xf32, #tpu.memory_space<vmem>>, vector<1x2x32xf32>,
    %118 = tpu.concatenate %96, %114 in 1 : vector<2x32xf32>, vector<2x32xf32> -> vector<2x64xf32>
    %cst_34 = arith.constant dense<0.000000e+00> : vector<2x256xf32>
    %119 = tpu.matmul %118, %6, %cst_34 {dimension_numbers = #tpu.dot_dimension_numbers<[1], [0], [0], [1], [0, 0, 1, 1], [], []>} : vector<2x64xf32>, vector<64x256xf32>, vector<2x256xf32> -> vector<2x256xf32>
    %120 = vector.extract_strided_slice %119 {offsets = [0, 0], sizes = [2, 128], strides = [1, 1]} : vector<2x256xf32> to vector<2x128xf32>
    %121 = vector.extract_strided_slice %5 {offsets = [6, 0], sizes = [2, 128], strides = [1, 1]} : vector<16x128xf32> to vector<2x128xf32>
    %122 = arith.addf %120, %121 : vector<2x128xf32>
    %123 = arith.negf %122 : vector<2x128xf32>
    %124 = math.exp %123 : vector<2x128xf32>
    %cst_35 = arith.constant 1.000000e+00 : f32
    %125 = vector.broadcast %cst_35 : f32 to vector<2x128xf32>
    %126 = arith.addf %125, %124 : vector<2x128xf32>
    %127 = arith.divf %125, %126 : vector<2x128xf32>
    %128 = math.tanh %122 : vector<2x128xf32>
    %129 = vector.extract_strided_slice %127 {offsets = [0, 0], sizes = [2, 32], strides = [1, 1]} : vector<2x128xf32> to vector<2x32xf32>
    %130 = vector.extract_strided_slice %127 {offsets = [0, 32], sizes = [2, 32], strides = [1, 1]} : vector<2x128xf32> to vector<2x32xf32>
    %131 = vector.extract_strided_slice %128 {offsets = [0, 64], sizes = [2, 32], strides = [1, 1]} : vector<2x128xf32> to vector<2x32xf32>
    %132 = vector.extract_strided_slice %127 {offsets = [0, 96], sizes = [2, 32], strides = [1, 1]} : vector<2x128xf32> to vector<2x32xf32>
    %133 = arith.mulf %130, %94 : vector<2x32xf32>
    %134 = arith.mulf %129, %131 : vector<2x32xf32>
    %135 = arith.addf %133, %134 : vector<2x32xf32>
    %136 = math.tanh %135 : vector<2x32xf32>
    %137 = arith.mulf %132, %136 : vector<2x32xf32>
    %138 = vector.extract_strided_slice %119 {offsets = [0, 128], sizes = [2, 128], strides = [1, 1]} : vector<2x256xf32> to vector<2x128xf32>
    %139 = vector.broadcast %7 : vector<1x128xf32> to vector<2x128xf32>
    %140 = arith.addf %138, %139 : vector<2x128xf32>
    %141 = arith.negf %140 : vector<2x128xf32>
    %142 = math.exp %141 : vector<2x128xf32>
    %cst_36 = arith.constant 1.000000e+00 : f32
    %143 = vector.broadcast %cst_36 : f32 to vector<2x128xf32>
    %144 = arith.addf %143, %142 : vector<2x128xf32>
    %145 = arith.divf %143, %144 : vector<2x128xf32>
    %146 = math.tanh %140 : vector<2x128xf32>
    %147 = vector.extract_strided_slice %145 {offsets = [0, 0], sizes = [2, 32], strides = [1, 1]} : vector<2x128xf32> to vector<2x32xf32>
    %148 = vector.extract_strided_slice %145 {offsets = [0, 32], sizes = [2, 32], strides = [1, 1]} : vector<2x128xf32> to vector<2x32xf32>
    %149 = vector.extract_strided_slice %146 {offsets = [0, 64], sizes = [2, 32], strides = [1, 1]} : vector<2x128xf32> to vector<2x32xf32>
    %150 = vector.extract_strided_slice %145 {offsets = [0, 96], sizes = [2, 32], strides = [1, 1]} : vector<2x128xf32> to vector<2x32xf32>
    %151 = arith.mulf %148, %112 : vector<2x32xf32>
    %152 = arith.mulf %147, %149 : vector<2x32xf32>
    %153 = arith.addf %151, %152 : vector<2x32xf32>
    %154 = math.tanh %153 : vector<2x32xf32>
    %155 = arith.mulf %150, %154 : vector<2x32xf32>
    %c2 = arith.constant 2 : index
    %c0_37 = arith.constant 0 : index
    %c0_38 = arith.constant 0 : index
    %156 = vector.load %arg13[%c2, %c0_37, %c0_38] : memref<8x2x32xf32, #tpu.memory_space<vmem>>, vector<1x2x32xf32>
    %157 = vector.shape_cast %156 : vector<1x2x32xf32> to vector<2x32xf32>
    %158 = vector.shape_cast %155 : vector<2x32xf32> to vector<1x2x32xf32>
    tpu.vector_store %arg13[%c2, %c0_37, %c0_38], %158 {strides = array<i32>} : memref<8x2x32xf32, #tpu.memory_space<vmem>>, vector<1x2x32xf32>,
    %159 = tpu.concatenate %137, %155 in 1 : vector<2x32xf32>, vector<2x32xf32> -> vector<2x64xf32>
    %cst_39 = arith.constant dense<0.000000e+00> : vector<2x256xf32>
    %160 = tpu.matmul %159, %6, %cst_39 {dimension_numbers = #tpu.dot_dimension_numbers<[1], [0], [0], [1], [0, 0, 1, 1], [], []>} : vector<2x64xf32>, vector<64x256xf32>, vector<2x256xf32> -> vector<2x256xf32>
    %161 = vector.extract_strided_slice %160 {offsets = [0, 0], sizes = [2, 128], strides = [1, 1]} : vector<2x256xf32> to vector<2x128xf32>
    %162 = vector.extract_strided_slice %5 {offsets = [8, 0], sizes = [2, 128], strides = [1, 1]} : vector<16x128xf32> to vector<2x128xf32>
    %163 = arith.addf %161, %162 : vector<2x128xf32>
    %164 = arith.negf %163 : vector<2x128xf32>
    %165 = math.exp %164 : vector<2x128xf32>
    %cst_40 = arith.constant 1.000000e+00 : f32
    %166 = vector.broadcast %cst_40 : f32 to vector<2x128xf32>
    %167 = arith.addf %166, %165 : vector<2x128xf32>
    %168 = arith.divf %166, %167 : vector<2x128xf32>
    %169 = math.tanh %163 : vector<2x128xf32>
    %170 = vector.extract_strided_slice %168 {offsets = [0, 0], sizes = [2, 32], strides = [1, 1]} : vector<2x128xf32> to vector<2x32xf32>
    %171 = vector.extract_strided_slice %168 {offsets = [0, 32], sizes = [2, 32], strides = [1, 1]} : vector<2x128xf32> to vector<2x32xf32>
    %172 = vector.extract_strided_slice %169 {offsets = [0, 64], sizes = [2, 32], strides = [1, 1]} : vector<2x128xf32> to vector<2x32xf32>
    %173 = vector.extract_strided_slice %168 {offsets = [0, 96], sizes = [2, 32], strides = [1, 1]} : vector<2x128xf32> to vector<2x32xf32>
    %174 = arith.mulf %171, %135 : vector<2x32xf32>
    %175 = arith.mulf %170, %172 : vector<2x32xf32>
    %176 = arith.addf %174, %175 : vector<2x32xf32>
    %177 = math.tanh %176 : vector<2x32xf32>
    %178 = arith.mulf %173, %177 : vector<2x32xf32>
    %179 = vector.extract_strided_slice %160 {offsets = [0, 128], sizes = [2, 128], strides = [1, 1]} : vector<2x256xf32> to vector<2x128xf32>
    %180 = vector.broadcast %7 : vector<1x128xf32> to vector<2x128xf32>
    %181 = arith.addf %179, %180 : vector<2x128xf32>
    %182 = arith.negf %181 : vector<2x128xf32>
    %183 = math.exp %182 : vector<2x128xf32>
    %cst_41 = arith.constant 1.000000e+00 : f32
    %184 = vector.broadcast %cst_41 : f32 to vector<2x128xf32>
    %185 = arith.addf %184, %183 : vector<2x128xf32>
    %186 = arith.divf %184, %185 : vector<2x128xf32>
    %187 = math.tanh %181 : vector<2x128xf32>
    %188 = vector.extract_strided_slice %186 {offsets = [0, 0], sizes = [2, 32], strides = [1, 1]} : vector<2x128xf32> to vector<2x32xf32>
    %189 = vector.extract_strided_slice %186 {offsets = [0, 32], sizes = [2, 32], strides = [1, 1]} : vector<2x128xf32> to vector<2x32xf32>
    %190 = vector.extract_strided_slice %187 {offsets = [0, 64], sizes = [2, 32], strides = [1, 1]} : vector<2x128xf32> to vector<2x32xf32>
    %191 = vector.extract_strided_slice %186 {offsets = [0, 96], sizes = [2, 32], strides = [1, 1]} : vector<2x128xf32> to vector<2x32xf32>
    %192 = arith.mulf %189, %153 : vector<2x32xf32>
    %193 = arith.mulf %188, %190 : vector<2x32xf32>
    %194 = arith.addf %192, %193 : vector<2x32xf32>
    %195 = math.tanh %194 : vector<2x32xf32>
    %196 = arith.mulf %191, %195 : vector<2x32xf32>
    %c3 = arith.constant 3 : index
    %c0_42 = arith.constant 0 : index
    %c0_43 = arith.constant 0 : index
    %197 = vector.load %arg13[%c3, %c0_42, %c0_43] : memref<8x2x32xf32, #tpu.memory_space<vmem>>, vector<1x2x32xf32>
    %198 = vector.shape_cast %197 : vector<1x2x32xf32> to vector<2x32xf32>
    %199 = vector.shape_cast %196 : vector<2x32xf32> to vector<1x2x32xf32>
    tpu.vector_store %arg13[%c3, %c0_42, %c0_43], %199 {strides = array<i32>} : memref<8x2x32xf32, #tpu.memory_space<vmem>>, vector<1x2x32xf32>,
    %200 = tpu.concatenate %178, %196 in 1 : vector<2x32xf32>, vector<2x32xf32> -> vector<2x64xf32>
    %cst_44 = arith.constant dense<0.000000e+00> : vector<2x256xf32>
    %201 = tpu.matmul %200, %6, %cst_44 {dimension_numbers = #tpu.dot_dimension_numbers<[1], [0], [0], [1], [0, 0, 1, 1], [], []>} : vector<2x64xf32>, vector<64x256xf32>, vector<2x256xf32> -> vector<2x256xf32>
    %202 = vector.extract_strided_slice %201 {offsets = [0, 0], sizes = [2, 128], strides = [1, 1]} : vector<2x256xf32> to vector<2x128xf32>
    %203 = vector.extract_strided_slice %5 {offsets = [10, 0], sizes = [2, 128], strides = [1, 1]} : vector<16x128xf32> to vector<2x128xf32>
    %204 = arith.addf %202, %203 : vector<2x128xf32>
    %205 = arith.negf %204 : vector<2x128xf32>
    %206 = math.exp %205 : vector<2x128xf32>
    %cst_45 = arith.constant 1.000000e+00 : f32
    %207 = vector.broadcast %cst_45 : f32 to vector<2x128xf32>
    %208 = arith.addf %207, %206 : vector<2x128xf32>
    %209 = arith.divf %207, %208 : vector<2x128xf32>
    %210 = math.tanh %204 : vector<2x128xf32>
    %211 = vector.extract_strided_slice %209 {offsets = [0, 0], sizes = [2, 32], strides = [1, 1]} : vector<2x128xf32> to vector<2x32xf32>
    %212 = vector.extract_strided_slice %209 {offsets = [0, 32], sizes = [2, 32], strides = [1, 1]} : vector<2x128xf32> to vector<2x32xf32>
    %213 = vector.extract_strided_slice %210 {offsets = [0, 64], sizes = [2, 32], strides = [1, 1]} : vector<2x128xf32> to vector<2x32xf32>
    %214 = vector.extract_strided_slice %209 {offsets = [0, 96], sizes = [2, 32], strides = [1, 1]} : vector<2x128xf32> to vector<2x32xf32>
    %215 = arith.mulf %212, %176 : vector<2x32xf32>
    %216 = arith.mulf %211, %213 : vector<2x32xf32>
    %217 = arith.addf %215, %216 : vector<2x32xf32>
    %218 = math.tanh %217 : vector<2x32xf32>
    %219 = arith.mulf %214, %218 : vector<2x32xf32>
    %220 = vector.extract_strided_slice %201 {offsets = [0, 128], sizes = [2, 128], strides = [1, 1]} : vector<2x256xf32> to vector<2x128xf32>
    %221 = vector.broadcast %7 : vector<1x128xf32> to vector<2x128xf32>
    %222 = arith.addf %220, %221 : vector<2x128xf32>
    %223 = arith.negf %222 : vector<2x128xf32>
    %224 = math.exp %223 : vector<2x128xf32>
    %cst_46 = arith.constant 1.000000e+00 : f32
    %225 = vector.broadcast %cst_46 : f32 to vector<2x128xf32>
    %226 = arith.addf %225, %224 : vector<2x128xf32>
    %227 = arith.divf %225, %226 : vector<2x128xf32>
    %228 = math.tanh %222 : vector<2x128xf32>
    %229 = vector.extract_strided_slice %227 {offsets = [0, 0], sizes = [2, 32], strides = [1, 1]} : vector<2x128xf32> to vector<2x32xf32>
    %230 = vector.extract_strided_slice %227 {offsets = [0, 32], sizes = [2, 32], strides = [1, 1]} : vector<2x128xf32> to vector<2x32xf32>
    %231 = vector.extract_strided_slice %228 {offsets = [0, 64], sizes = [2, 32], strides = [1, 1]} : vector<2x128xf32> to vector<2x32xf32>
    %232 = vector.extract_strided_slice %227 {offsets = [0, 96], sizes = [2, 32], strides = [1, 1]} : vector<2x128xf32> to vector<2x32xf32>
    %233 = arith.mulf %230, %194 : vector<2x32xf32>
    %234 = arith.mulf %229, %231 : vector<2x32xf32>
    %235 = arith.addf %233, %234 : vector<2x32xf32>
    %236 = math.tanh %235 : vector<2x32xf32>
    %237 = arith.mulf %232, %236 : vector<2x32xf32>
    %c4 = arith.constant 4 : index
    %c0_47 = arith.constant 0 : index
    %c0_48 = arith.constant 0 : index
    %238 = vector.load %arg13[%c4, %c0_47, %c0_48] : memref<8x2x32xf32, #tpu.memory_space<vmem>>, vector<1x2x32xf32>
    %239 = vector.shape_cast %238 : vector<1x2x32xf32> to vector<2x32xf32>
    %240 = vector.shape_cast %237 : vector<2x32xf32> to vector<1x2x32xf32>
    tpu.vector_store %arg13[%c4, %c0_47, %c0_48], %240 {strides = array<i32>} : memref<8x2x32xf32, #tpu.memory_space<vmem>>, vector<1x2x32xf32>,
    %241 = tpu.concatenate %219, %237 in 1 : vector<2x32xf32>, vector<2x32xf32> -> vector<2x64xf32>
    %cst_49 = arith.constant dense<0.000000e+00> : vector<2x256xf32>
    %242 = tpu.matmul %241, %6, %cst_49 {dimension_numbers = #tpu.dot_dimension_numbers<[1], [0], [0], [1], [0, 0, 1, 1], [], []>} : vector<2x64xf32>, vector<64x256xf32>, vector<2x256xf32> -> vector<2x256xf32>
    %243 = vector.extract_strided_slice %242 {offsets = [0, 0], sizes = [2, 128], strides = [1, 1]} : vector<2x256xf32> to vector<2x128xf32>
    %244 = vector.extract_strided_slice %5 {offsets = [12, 0], sizes = [2, 128], strides = [1, 1]} : vector<16x128xf32> to vector<2x128xf32>
    %245 = arith.addf %243, %244 : vector<2x128xf32>
    %246 = arith.negf %245 : vector<2x128xf32>
    %247 = math.exp %246 : vector<2x128xf32>
    %cst_50 = arith.constant 1.000000e+00 : f32
    %248 = vector.broadcast %cst_50 : f32 to vector<2x128xf32>
    %249 = arith.addf %248, %247 : vector<2x128xf32>
    %250 = arith.divf %248, %249 : vector<2x128xf32>
    %251 = math.tanh %245 : vector<2x128xf32>
    %252 = vector.extract_strided_slice %250 {offsets = [0, 0], sizes = [2, 32], strides = [1, 1]} : vector<2x128xf32> to vector<2x32xf32>
    %253 = vector.extract_strided_slice %250 {offsets = [0, 32], sizes = [2, 32], strides = [1, 1]} : vector<2x128xf32> to vector<2x32xf32>
    %254 = vector.extract_strided_slice %251 {offsets = [0, 64], sizes = [2, 32], strides = [1, 1]} : vector<2x128xf32> to vector<2x32xf32>
    %255 = vector.extract_strided_slice %250 {offsets = [0, 96], sizes = [2, 32], strides = [1, 1]} : vector<2x128xf32> to vector<2x32xf32>
    %256 = arith.mulf %253, %217 : vector<2x32xf32>
    %257 = arith.mulf %252, %254 : vector<2x32xf32>
    %258 = arith.addf %256, %257 : vector<2x32xf32>
    %259 = math.tanh %258 : vector<2x32xf32>
    %260 = arith.mulf %255, %259 : vector<2x32xf32>
    %261 = vector.extract_strided_slice %242 {offsets = [0, 128], sizes = [2, 128], strides = [1, 1]} : vector<2x256xf32> to vector<2x128xf32>
    %262 = vector.broadcast %7 : vector<1x128xf32> to vector<2x128xf32>
    %263 = arith.addf %261, %262 : vector<2x128xf32>
    %264 = arith.negf %263 : vector<2x128xf32>
    %265 = math.exp %264 : vector<2x128xf32>
    %cst_51 = arith.constant 1.000000e+00 : f32
    %266 = vector.broadcast %cst_51 : f32 to vector<2x128xf32>
    %267 = arith.addf %266, %265 : vector<2x128xf32>
    %268 = arith.divf %266, %267 : vector<2x128xf32>
    %269 = math.tanh %263 : vector<2x128xf32>
    %270 = vector.extract_strided_slice %268 {offsets = [0, 0], sizes = [2, 32], strides = [1, 1]} : vector<2x128xf32> to vector<2x32xf32>
    %271 = vector.extract_strided_slice %268 {offsets = [0, 32], sizes = [2, 32], strides = [1, 1]} : vector<2x128xf32> to vector<2x32xf32>
    %272 = vector.extract_strided_slice %269 {offsets = [0, 64], sizes = [2, 32], strides = [1, 1]} : vector<2x128xf32> to vector<2x32xf32>
    %273 = vector.extract_strided_slice %268 {offsets = [0, 96], sizes = [2, 32], strides = [1, 1]} : vector<2x128xf32> to vector<2x32xf32>
    %274 = arith.mulf %271, %235 : vector<2x32xf32>
    %275 = arith.mulf %270, %272 : vector<2x32xf32>
    %276 = arith.addf %274, %275 : vector<2x32xf32>
    %277 = math.tanh %276 : vector<2x32xf32>
    %278 = arith.mulf %273, %277 : vector<2x32xf32>
    %c5 = arith.constant 5 : index
    %c0_52 = arith.constant 0 : index
    %c0_53 = arith.constant 0 : index
    %279 = vector.load %arg13[%c5, %c0_52, %c0_53] : memref<8x2x32xf32, #tpu.memory_space<vmem>>, vector<1x2x32xf32>
    %280 = vector.shape_cast %279 : vector<1x2x32xf32> to vector<2x32xf32>
    %281 = vector.shape_cast %278 : vector<2x32xf32> to vector<1x2x32xf32>
    tpu.vector_store %arg13[%c5, %c0_52, %c0_53], %281 {strides = array<i32>} : memref<8x2x32xf32, #tpu.memory_space<vmem>>, vector<1x2x32xf32>,
    %282 = tpu.concatenate %260, %278 in 1 : vector<2x32xf32>, vector<2x32xf32> -> vector<2x64xf32>
    %cst_54 = arith.constant dense<0.000000e+00> : vector<2x256xf32>
    %283 = tpu.matmul %282, %6, %cst_54 {dimension_numbers = #tpu.dot_dimension_numbers<[1], [0], [0], [1], [0, 0, 1, 1], [], []>} : vector<2x64xf32>, vector<64x256xf32>, vector<2x256xf32> -> vector<2x256xf32>
    %284 = vector.extract_strided_slice %283 {offsets = [0, 0], sizes = [2, 128], strides = [1, 1]} : vector<2x256xf32> to vector<2x128xf32>
    %285 = vector.extract_strided_slice %5 {offsets = [14, 0], sizes = [2, 128], strides = [1, 1]} : vector<16x128xf32> to vector<2x128xf32>
    %286 = arith.addf %284, %285 : vector<2x128xf32>
    %287 = arith.negf %286 : vector<2x128xf32>
    %288 = math.exp %287 : vector<2x128xf32>
    %cst_55 = arith.constant 1.000000e+00 : f32
    %289 = vector.broadcast %cst_55 : f32 to vector<2x128xf32>
    %290 = arith.addf %289, %288 : vector<2x128xf32>
    %291 = arith.divf %289, %290 : vector<2x128xf32>
    %292 = math.tanh %286 : vector<2x128xf32>
    %293 = vector.extract_strided_slice %291 {offsets = [0, 0], sizes = [2, 32], strides = [1, 1]} : vector<2x128xf32> to vector<2x32xf32>
    %294 = vector.extract_strided_slice %291 {offsets = [0, 32], sizes = [2, 32], strides = [1, 1]} : vector<2x128xf32> to vector<2x32xf32>
    %295 = vector.extract_strided_slice %292 {offsets = [0, 64], sizes = [2, 32], strides = [1, 1]} : vector<2x128xf32> to vector<2x32xf32>
    %296 = vector.extract_strided_slice %291 {offsets = [0, 96], sizes = [2, 32], strides = [1, 1]} : vector<2x128xf32> to vector<2x32xf32>
    %297 = arith.mulf %294, %258 : vector<2x32xf32>
    %298 = arith.mulf %293, %295 : vector<2x32xf32>
    %299 = arith.addf %297, %298 : vector<2x32xf32>
    %300 = math.tanh %299 : vector<2x32xf32>
    %301 = arith.mulf %296, %300 : vector<2x32xf32>
    %302 = vector.extract_strided_slice %283 {offsets = [0, 128], sizes = [2, 128], strides = [1, 1]} : vector<2x256xf32> to vector<2x128xf32>
    %303 = vector.broadcast %7 : vector<1x128xf32> to vector<2x128xf32>
    %304 = arith.addf %302, %303 : vector<2x128xf32>
    %305 = arith.negf %304 : vector<2x128xf32>
    %306 = math.exp %305 : vector<2x128xf32>
    %cst_56 = arith.constant 1.000000e+00 : f32
    %307 = vector.broadcast %cst_56 : f32 to vector<2x128xf32>
    %308 = arith.addf %307, %306 : vector<2x128xf32>
    %309 = arith.divf %307, %308 : vector<2x128xf32>
    %310 = math.tanh %304 : vector<2x128xf32>
    %311 = vector.extract_strided_slice %309 {offsets = [0, 0], sizes = [2, 32], strides = [1, 1]} : vector<2x128xf32> to vector<2x32xf32>
    %312 = vector.extract_strided_slice %309 {offsets = [0, 32], sizes = [2, 32], strides = [1, 1]} : vector<2x128xf32> to vector<2x32xf32>
    %313 = vector.extract_strided_slice %310 {offsets = [0, 64], sizes = [2, 32], strides = [1, 1]} : vector<2x128xf32> to vector<2x32xf32>
    %314 = vector.extract_strided_slice %309 {offsets = [0, 96], sizes = [2, 32], strides = [1, 1]} : vector<2x128xf32> to vector<2x32xf32>
    %315 = arith.mulf %312, %276 : vector<2x32xf32>
    %316 = arith.mulf %311, %313 : vector<2x32xf32>
    %317 = arith.addf %315, %316 : vector<2x32xf32>
    %318 = math.tanh %317 : vector<2x32xf32>
    %319 = arith.mulf %314, %318 : vector<2x32xf32>
    %c6 = arith.constant 6 : index
    %c0_57 = arith.constant 0 : index
    %c0_58 = arith.constant 0 : index
    %320 = vector.load %arg13[%c6, %c0_57, %c0_58] : memref<8x2x32xf32, #tpu.memory_space<vmem>>, vector<1x2x32xf32>
    %321 = vector.shape_cast %320 : vector<1x2x32xf32> to vector<2x32xf32>
    %322 = vector.shape_cast %319 : vector<2x32xf32> to vector<1x2x32xf32>
    tpu.vector_store %arg13[%c6, %c0_57, %c0_58], %322 {strides = array<i32>} : memref<8x2x32xf32, #tpu.memory_space<vmem>>, vector<1x2x32xf32>,
    %323 = tpu.concatenate %301, %319 in 1 : vector<2x32xf32>, vector<2x32xf32> -> vector<2x64xf32>
    %cst_59 = arith.constant dense<0.000000e+00> : vector<2x256xf32>
    %324 = tpu.matmul %323, %6, %cst_59 {dimension_numbers = #tpu.dot_dimension_numbers<[1], [0], [0], [1], [0, 0, 1, 1], [], []>} : vector<2x64xf32>, vector<64x256xf32>, vector<2x256xf32> -> vector<2x256xf32>
    %325 = vector.extract_strided_slice %324 {offsets = [0, 128], sizes = [2, 128], strides = [1, 1]} : vector<2x256xf32> to vector<2x128xf32>
    %326 = vector.broadcast %7 : vector<1x128xf32> to vector<2x128xf32>
    %327 = arith.addf %325, %326 : vector<2x128xf32>
    %328 = arith.negf %327 : vector<2x128xf32>
    %329 = math.exp %328 : vector<2x128xf32>
    %cst_60 = arith.constant 1.000000e+00 : f32
    %330 = vector.broadcast %cst_60 : f32 to vector<2x128xf32>
    %331 = arith.addf %330, %329 : vector<2x128xf32>
    %332 = arith.divf %330, %331 : vector<2x128xf32>
    %333 = math.tanh %327 : vector<2x128xf32>
    %334 = vector.extract_strided_slice %332 {offsets = [0, 0], sizes = [2, 32], strides = [1, 1]} : vector<2x128xf32> to vector<2x32xf32>
    %335 = vector.extract_strided_slice %332 {offsets = [0, 32], sizes = [2, 32], strides = [1, 1]} : vector<2x128xf32> to vector<2x32xf32>
    %336 = vector.extract_strided_slice %333 {offsets = [0, 64], sizes = [2, 32], strides = [1, 1]} : vector<2x128xf32> to vector<2x32xf32>
    %337 = vector.extract_strided_slice %332 {offsets = [0, 96], sizes = [2, 32], strides = [1, 1]} : vector<2x128xf32> to vector<2x32xf32>
    %338 = arith.mulf %335, %317 : vector<2x32xf32>
    %339 = arith.mulf %334, %336 : vector<2x32xf32>
    %340 = arith.addf %338, %339 : vector<2x32xf32>
    %341 = math.tanh %340 : vector<2x32xf32>
    %342 = arith.mulf %337, %341 : vector<2x32xf32>
    %c7 = arith.constant 7 : index
    %c0_61 = arith.constant 0 : index
    %c0_62 = arith.constant 0 : index
    %343 = vector.load %arg13[%c7, %c0_61, %c0_62] : memref<8x2x32xf32, #tpu.memory_space<vmem>>, vector<1x2x32xf32>
    %344 = vector.shape_cast %343 : vector<1x2x32xf32> to vector<2x32xf32>
    %345 = vector.shape_cast %342 : vector<2x32xf32> to vector<1x2x32xf32>
    tpu.vector_store %arg13[%c7, %c0_61, %c0_62], %345 {strides = array<i32>} : memref<8x2x32xf32, #tpu.memory_space<vmem>>, vector<1x2x32xf32>,
    %c0_63 = arith.constant 0 : index
    %c0_64 = arith.constant 0 : index
    %c0_65 = arith.constant 0 : index
    %346 = vector.load %arg11[%c0_63, %c0_64, %c0_65] : memref<2x2x32xf32, #tpu.memory_space<vmem>>, vector<1x2x32xf32>
    %347 = vector.shape_cast %346 : vector<1x2x32xf32> to vector<2x32xf32>
    %348 = vector.shape_cast %301 : vector<2x32xf32> to vector<1x2x32xf32>
    tpu.vector_store %arg11[%c0_63, %c0_64, %c0_65], %348 {strides = array<i32>} : memref<2x2x32xf32, #tpu.memory_space<vmem>>, vector<1x2x32xf32>,
    %c0_66 = arith.constant 0 : index
    %c0_67 = arith.constant 0 : index
    %c0_68 = arith.constant 0 : index
    %349 = vector.load %arg12[%c0_66, %c0_67, %c0_68] : memref<2x2x32xf32, #tpu.memory_space<vmem>>, vector<1x2x32xf32>
    %350 = vector.shape_cast %349 : vector<1x2x32xf32> to vector<2x32xf32>
    %351 = vector.shape_cast %299 : vector<2x32xf32> to vector<1x2x32xf32>
    tpu.vector_store %arg12[%c0_66, %c0_67, %c0_68], %351 {strides = array<i32>} : memref<2x2x32xf32, #tpu.memory_space<vmem>>, vector<1x2x32xf32>,
    %c1_69 = arith.constant 1 : index
    %c0_70 = arith.constant 0 : index
    %c0_71 = arith.constant 0 : index
    %352 = vector.load %arg11[%c1_69, %c0_70, %c0_71] : memref<2x2x32xf32, #tpu.memory_space<vmem>>, vector<1x2x32xf32>
    %353 = vector.shape_cast %352 : vector<1x2x32xf32> to vector<2x32xf32>
    %354 = vector.shape_cast %342 : vector<2x32xf32> to vector<1x2x32xf32>
    tpu.vector_store %arg11[%c1_69, %c0_70, %c0_71], %354 {strides = array<i32>} : memref<2x2x32xf32, #tpu.memory_space<vmem>>, vector<1x2x32xf32>,
    %c1_72 = arith.constant 1 : index
    %c0_73 = arith.constant 0 : index
    %c0_74 = arith.constant 0 : index
    %355 = vector.load %arg12[%c1_72, %c0_73, %c0_74] : memref<2x2x32xf32, #tpu.memory_space<vmem>>, vector<1x2x32xf32>
    %356 = vector.shape_cast %355 : vector<1x2x32xf32> to vector<2x32xf32>
    %357 = vector.shape_cast %340 : vector<2x32xf32> to vector<1x2x32xf32>
    tpu.vector_store %arg12[%c1_72, %c0_73, %c0_74], %357 {strides = array<i32>} : memref<2x2x32xf32, #tpu.memory_space<vmem>>, vector<1x2x32xf32>,
    %c0_75 = arith.constant 0 : index
    %c0_76 = arith.constant 0 : index
    %c0_77 = arith.constant 0 : index
    %358 = vector.load %arg13[%c0_75, %c0_76, %c0_77] : memref<8x2x32xf32, #tpu.memory_space<vmem>>, vector<8x2x32xf32>
    %359 = vector.extract_strided_slice %358 {offsets = [0, 0, 0], sizes = [8, 1, 32], strides = [1, 1, 1]} : vector<8x2x32xf32> to vector<8x1x32xf32>
    %360 = vector.shape_cast %359 : vector<8x1x32xf32> to vector<8x32xf32>
    %361 = vector.extract_strided_slice %358 {offsets = [0, 1, 0], sizes = [8, 1, 32], strides = [1, 1, 1]} : vector<8x2x32xf32> to vector<8x1x32xf32>
    %362 = vector.shape_cast %361 : vector<8x1x32xf32> to vector<8x32xf32>
    %363 = tpu.concatenate %360, %362 in 0 : vector<8x32xf32>, vector<8x32xf32> -> vector<16x32xf32>
    %c0_78 = arith.constant 0 : index
    %c0_79 = arith.constant 0 : index
    %364 = vector.load %arg8[%c0_78, %c0_79] : memref<32x4xf32, #tpu.memory_space<vmem>>, vector<32x4xf32>
    %cst_80 = arith.constant dense<0.000000e+00> : vector<16x4xf32>
    %365 = tpu.matmul %363, %364, %cst_80 {dimension_numbers = #tpu.dot_dimension_numbers<[1], [0], [0], [1], [0, 0, 1, 1], [], []>} : vector<16x32xf32>, vector<32x4xf32>, vector<16x4xf32> -> vector<16x4xf32>
    %c0_81 = arith.constant 0 : index
    %c0_82 = arith.constant 0 : index
    %366 = vector.load %arg9[%c0_81, %c0_82] : memref<1x4xf32, #tpu.memory_space<vmem>>, vector<1x4xf32>
    %367 = vector.broadcast %366 : vector<1x4xf32> to vector<16x4xf32>
    %368 = arith.addf %365, %367 : vector<16x4xf32>
    %c0_83 = arith.constant 0 : index
    %c0_84 = arith.constant 0 : index
    %369 = vector.load %arg10[%c0_83, %c0_84] : memref<16x4xf32, #tpu.memory_space<vmem>>, vector<16x4xf32>
    tpu.vector_store %arg10[%c0_83, %c0_84], %368 {strides = array<i32>} : memref<16x4xf32, #tpu.memory_space<vmem>>, vector<16x4xf32>,
    return
  }
  func.func @transform_0(%arg0: i32) -> (i32, i32) {
    %c0_i32 = arith.constant 0 : i32
    %c0_i32_0 = arith.constant 0 : i32
    %c0_i32_1 = arith.constant 0 : i32
    return %c0_i32, %c0_i32_0 : i32, i32
  }
  func.func @transform_1(%arg0: i32) -> (i32, i32, i32) {
    %c0_i32 = arith.constant 0 : i32
    %c0_i32_0 = arith.constant 0 : i32
    %c0_i32_1 = arith.constant 0 : i32
    %c0_i32_2 = arith.constant 0 : i32
    return %c0_i32, %c0_i32_0, %c0_i32_1 : i32, i32, i32
  }
  func.func @transform_2(%arg0: i32) -> (i32, i32, i32) {
    %c0_i32 = arith.constant 0 : i32
    %c0_i32_0 = arith.constant 0 : i32
    %c0_i32_1 = arith.constant 0 : i32
    %c0_i32_2 = arith.constant 0 : i32
    return %c0_i32, %c0_i32_0, %c0_i32_1 : i32, i32, i32
  }
  func.func @transform_3(%arg0: i32) -> (i32, i32) {
    %c0_i32 = arith.constant 0 : i32
    %c0_i32_0 = arith.constant 0 : i32
    %c0_i32_1 = arith.constant 0 : i32
    return %c0_i32, %c0_i32_0 : i32, i32
  }
  func.func @transform_4(%arg0: i32) -> (i32, i32) {
    %c0_i32 = arith.constant 0 : i32
    %c0_i32_0 = arith.constant 0 : i32
    %c0_i32_1 = arith.constant 0 : i32
    return %c0_i32, %c0_i32_0 : i32, i32
  }
  func.func @transform_5(%arg0: i32) -> (i32, i32) {
    %c0_i32 = arith.constant 0 : i32
    %c0_i32_0 = arith.constant 0 : i32
    %c0_i32_1 = arith.constant 0 : i32
    return %c0_i32, %c0_i32_0 : i32, i32
  }
  func.func @transform_6(%arg0: i32) -> (i32, i32) {
    %c0_i32 = arith.constant 0 : i32
    %c0_i32_0 = arith.constant 0 : i32
    %c0_i32_1 = arith.constant 0 : i32
    return %c0_i32, %c0_i32_0 : i32, i32
  }
  func.func @transform_7(%arg0: i32) -> (i32, i32) {
    %c0_i32 = arith.constant 0 : i32
    %c0_i32_0 = arith.constant 0 : i32
    %c0_i32_1 = arith.constant 0 : i32
    return %c0_i32, %c0_i32_0 : i32, i32
  }
  func.func @transform_8(%arg0: i32) -> (i32, i32) {
    %c0_i32 = arith.constant 0 : i32
    %c0_i32_0 = arith.constant 0 : i32
    %c0_i32_1 = arith.constant 0 : i32
    return %c0_i32, %c0_i32_0 : i32, i32
  }
  func.func @transform_9(%arg0: i32) -> (i32, i32) {
    %c0_i32 = arith.constant 0 : i32
    %c0_i32_0 = arith.constant 0 : i32
    %c0_i32_1 = arith.constant 0 : i32
    return %c0_i32, %c0_i32_0 : i32, i32
  }
  func.func @transform_10(%arg0: i32) -> (i32, i32, i32) {
    %c0_i32 = arith.constant 0 : i32
    %c0_i32_0 = arith.constant 0 : i32
    %c0_i32_1 = arith.constant 0 : i32
    %c0_i32_2 = arith.constant 0 : i32
    return %c0_i32, %c0_i32_0, %c0_i32_1 : i32, i32, i32
  }
  func.func @transform_11(%arg0: i32) -> (i32, i32, i32) {
    %c0_i32 = arith.constant 0 : i32
    %c0_i32_0 = arith.constant 0 : i32
    %c0_i32_1 = arith.constant 0 : i32
    %c0_i32_2 = arith.constant 0 : i32
    return %c0_i32, %c0_i32_0, %c0_i32_1 : i32, i32, i32
  }
}

</mosaic_0001>

<bundles_post_ra>
// kernel: lstm_forward.1
= control target key start
LH: loop header
LB: loop body
LE: loop exit
PB: predicated region body
PF: predicated region fallthrough
CT: control target
= control target key end

     0   :  { %17 = vsyncpa [#allocation4], 0  ;;  %s1952_s23 = smov 32   ;;  %vm54_vm0 = vcmask 1043456   ;;  %v1953_v11 = vmov 0.0   ;;  %vm47_vm1 = vcmask 31744   ;;  %s2400_s0 = inlined_call_operand.vmem [shape: f32[16,4], index: 0, kind: input, shape index: {}]   ;;  %s2401_s1 = inlined_call_operand.vmem [shape: f32[2,2,32], index: 1, kind: input, shape index: {}]   ;;  %s2402_s2 = inlined_call_operand.vmem [shape: f32[2,2,32], index: 2, kind: input, shape index: {}]   ;;  %s2403_s3 = inlined_call_operand.vmem [shape: f32[4,128], index: 3, kind: input, shape index: {}]   ;;  %s2404_s4 = inlined_call_operand.vmem [shape: f32[1,128], index: 4, kind: input, shape index: {}]   ;;  %s2405_s5 = inlined_call_operand.vmem [shape: f32[64,256], index: 5, kind: input, shape index: {}]   ;;  %s2406_s6 = inlined_call_operand.vmem [shape: f32[1,128], index: 6, kind: input, shape index: {}]   ;;  %s2407_s7 = inlined_call_operand.vmem [shape: f32[32,4], index: 7, kind: input, shape index: {}]   ;;  %s2408_s8 = inlined_call_operand.vmem [shape: f32[1,4], index: 8, kind: input, shape index: {}]   ;;  %s2409_s9 = inlined_call_operand.vmem [shape: f32[16,4], index: 9, kind: output, shape index: {0}]   ;;  %s2410_s10 = inlined_call_operand.hbm [shape: f32[2,2,32], index: 10, kind: output, shape index: {1}]   ;;  %s2411_s11 = inlined_call_operand.hbm [shape: f32[2,2,32], index: 11, kind: output, shape index: {2}]  }
   0x1   :  { %v1561_v0 = vld [vmem:[%s2401_s1 + $0x2] sm:$0x3]  ;;  %v134_v1 = vld [vmem:[%s2405_s5 + $0x8] sm:$0xff]  ;;  %v136_v2 = vld [vmem:[%s2405_s5 + $0x18] sm:$0xff]  ;;  %230 = vmatprep.mubr.f32.mxu1 %v1953_v11 }
   0x2   :  { %157 = vrot.lane.b32.xlu0 %v1561_v0, %s1952_s23  ;;  %v2029_v3 = vpack.c.bf16 %v136_v2, %v134_v1  ;;  %v133_v4 = vld [vmem:[%s2405_s5] sm:$0xff]  ;;  %v135_v5 = vld [vmem:[%s2405_s5 + $0x10] sm:$0xff]  ;;  %v138_v6 = vld [vmem:[%s2405_s5 + $0x28] sm:$0xff] }
   0x3   :  { %v2040_v7 = vpack.c.bf16 %v135_v5, %v133_v4  ;;  %v140_v8 = vld [vmem:[%s2405_s5 + $0x38] sm:$0xff]  ;;  %v137_v9 = vld [vmem:[%s2405_s5 + $0x20] sm:$0xff]  ;;  %v139_v10 = vld [vmem:[%s2405_s5 + $0x30] sm:$0xff] }
   0x4   :  { %1618 = vmatprep.subr.bf16.mxu1 %v2029_v3  ;;  %v2053_v12 = vpack.c.bf16 %v140_v8, %v138_v6  ;;  %v142_v13 = vld [vmem:[%s2405_s5 + $0x48] sm:$0xff]  ;;  %v144_v14 = vld [vmem:[%s2405_s5 + $0x58] sm:$0xff]  ;;  %v2062_v15 = vpack.c.bf16 %v139_v10, %v137_v9  ;;  %v39_v16 = vld [vmem:[%s2403_s3] sm:$0xf] }
   0x5   :  { %1620 = vmatpush1.bf16.msra.mxu1 %v2040_v7  ;;  %v37_v17 = vld [vmem:[%s2400_s0] sm:$0xff]  ;;  %v2071_v18 = vpack.c.bf16 %v144_v14, %v142_v13  ;;  %v143_v20 = vld [vmem:[%s2405_s5 + $0x50] sm:$0xff]  ;;  %1601 = vmatprep.subr.msk.mxu0 %vm54_vm0, %v39_v16  ;;  %v38_v21 = vld [vmem:[%s2400_s0 + $0x8] sm:$0xff] }
   0x6   :  { %1622 = vmatprep.subr.bf16.mxu1 %v2053_v12  ;;  %v141_v19 = vld [vmem:[%s2405_s5 + $0x40] sm:$0xff]  ;;  %1602 = vmatpush3.msk.msra.mxu0 %vm54_vm0, %v39_v16  ;;  %v146_v22 = vld [vmem:[%s2405_s5 + $0x68] sm:$0xff]  ;;  %v148_v23 = vld [vmem:[%s2405_s5 + $0x78] sm:$0xff] }
   0x7   :  { %1603 = vmatprep.mubr.msk.f32.mxu0 %vm47_vm1, %v37_v17  ;;  %v153_v24 = vld [vmem:[%s2402_s2] sm:$0x3]  ;;  %1634 = vmatprep.subr.bf16.mxu0 %v2029_v3 }
   0x8   :  { %1604 = vmatmul.mubr.msk.f32.vlgmr.msra.gmra.mrb[0].mxu0 %vm47_vm1, %v38_v21 }
   0x9   :  { %18 = vsyncpa [#allocation6], 0  ;;  %1624 = vmatpush1.bf16.msra.mxu1 %v2062_v15  ;;  %v2097_v25 = vpack.c.bf16 %v143_v20, %v141_v19  ;;  %245 = vrot.lane.b32.xlu1 %v153_v24, %s1952_s23  ;;  %v2101_v26 = vpack.c.bf16 %v148_v23, %v146_v22  ;;  %v145_v27 = vld [vmem:[%s2405_s5 + $0x60] sm:$0xff]  ;;  %v147_v28 = vld [vmem:[%s2405_s5 + $0x70] sm:$0xff]  ;;  %vm160_vm2 = vcmask 261120   ;;  %vm162_vm3 = vcmask 523264  }
   0xa   :  { %1626 = vmatprep.subr.bf16.mxu1 %v2071_v18  ;;  %1636 = vmatpush1.bf16.msra.mxu0 %v2040_v7  ;;  %v2113_v29 = vpack.c.bf16 %v147_v28, %v145_v27  ;;  %v150_v30 = vld [vmem:[%s2401_s1] sm:$0x3]  ;;  %s1954_s24 = smov 64   ;;  %v1562_v1 = vld [vmem:[%s2402_s2 + $0x2] sm:$0x3]  ;;  %vm411_vm4 = vcmask 254976  }
   0xb   :  { %1638 = vmatprep.subr.bf16.mxu0 %v2053_v12  ;;  %337 = vmatprep.mubr.f32.mxu0 %v1953_v11  ;;  %v1557_v33 = vld [vmem:[%s2404_s4] ss:$0 sm:$0xff]  ;;  %s1955_s2 = smov 96   ;;  %vm1395_vm5 = vcmask 1041409   ;;  %vm1398_vm6 = vcmask 1042434   ;;  %vm1401_vm7 = vcmask 1043459  }
   0xc   :  { %v2165_v58 = vld [vmem:[%s2406_s6] ss:$0 sm:$0xff]  ;;  %vm1404_vm8 = vcmask 1044484   ;;  %vm1407_vm9 = vcmask 1045509   ;;  %vm1410_vm10 = vcmask 1046534   ;;  %vm1413_vm11 = vcmask 1047559  }
   0xd   :  { %1628 = vmatpush1.bf16.msra.mxu1 %v2097_v25  ;;  %s1957_s16 = smov [#allocation5]  }
   0xe   :  { %1630 = vmatprep.subr.bf16.mxu1 %v2101_v26  ;;  %1640 = vmatpush1.bf16.msra.mxu0 %v2062_v15  ;;  %s1540_s17 = sshll.u32 %s1957_s16, 4  ;;  %s1541_s17 = int_to_ptr.vmem [resolvable:$true] %s1540_s17 }
   0xf   :  { %1642 = vmatprep.subr.bf16.mxu0 %v2071_v18 }
  0x11   :  { %1632 = vmatpush1.bf16.msra.mxu1 %v2113_v29 }
  0x12   :  { %1644 = vmatpush1.bf16.msra.mxu0 %v2097_v25  ;;  %1650 = vmatprep.subr.bf16.mxu1 %v2029_v3 }
  0x13   :  { %1646 = vmatprep.subr.bf16.mxu0 %v2101_v26 }
  0x16   :  { %1648 = vmatpush1.bf16.msra.mxu0 %v2113_v29 }
  0x17   :  { %1666 = vmatprep.subr.bf16.mxu0 %v2029_v3 }
  0x74   :  { %v158_v31 = vpop.permute.xlu0 %157 }
  0x75   :  { %v161_v32 = vsel %vm160_vm2, %v150_v30, %v158_v31 }
  0x76   :  { %1563 = vmatmul.mubr.msk.f32.vlgmr.msra.gmra.mrb[0].mxu1 %vm162_vm3, %v161_v32 }
  0x77   :  { %1652 = vmatpush1.bf16.msra.mxu1 %v2040_v7  ;;  %488 = vmatprep.mubr.f32.mxu1 %v1953_v11 }
  0x78   :  { %1654 = vmatprep.subr.bf16.mxu1 %v2053_v12 }
  0x7b   :  { %1656 = vmatpush1.bf16.msra.mxu1 %v2062_v15  ;;  %v246_v48 = vpop.permute.xlu1 %245 }
  0x7c   :  { %1658 = vmatprep.subr.bf16.mxu1 %v2071_v18 }
  0x7f   :  { %1660 = vmatpush1.bf16.msra.mxu1 %v2097_v25 }
  0x80   :  { %1662 = vmatprep.subr.bf16.mxu1 %v2101_v26 }
  0x83   :  { %1664 = vmatpush1.bf16.msra.mxu1 %v2113_v29 }
  0x84   :  { %1682 = vmatprep.subr.bf16.mxu1 %v2029_v3 }
  0xdb   :  { %v1605_v34 = vpop.f32.mrb[0].mxu0 }
  0xdc   :  { %v2141_v35 = vadd.f32 %v1605_v34, %v1557_v33  ;;  %v124_v36 = vpop.f32.mrb[1].mxu0 }
  0xdd   :  { %v2143_v37 = vadd.f32 %v1557_v33, %v124_v36 }
  0xdf   :  { %v345_v57 = vrot.slane %v2143_v37, 2 }
 0x149   :  { %v232_v38 = vpop.f32.mrb[0].mxu1 }
 0x14a   :  { %v236_v39 = vadd.f32 %v232_v38, %v2143_v37  ;;  %v234_v40 = vpop.f32.mrb[1].mxu1 }
 0x14c   :  { %1776 = vtanh.f32 %v236_v39  ;;  %v1564_v42 = vmul.f32 -1.442695, %v236_v39 }
 0x14e   :  { %1778 = vpow2.f32 %v1564_v42 }
 0x156   :  { %v1777_v41 = vpop.eup %1776 }
 0x157   :  { %250 = vrot.lane.b32.xlu0 %v1777_v41, %s1954_s24  ;;  %v495_v41 = vrot.slane %v2143_v37, 4 }
 0x158   :  { %v1779_v43 = vpop.eup %1778 }
 0x159   :  { %v240_v44 = vadd.f32 1.0, %v1779_v43 }
 0x15b   :  { %1780 = vrcp.f32 %v240_v44 }
 0x165   :  { %v1781_v45 = vpop.eup %1780 }
 0x166   :  { %v248_v49 = vmul.f32 %v1781_v45, %v246_v48 }
 0x1c9   :  { %v251_v46 = vpop.permute.xlu0 %250 }
 0x1ca   :  { %v253_v47 = vmul.f32 %v1781_v45, %v251_v46 }
 0x1cc   :  { %255 = vrot.lane.b32.xlu1 %v253_v47, %s1952_s23 }
 0x23e   :  { %v256_v50 = vpop.permute.xlu1 %255 }
 0x23f   :  { %v258_v51 = vadd.f32 %v256_v50, %v248_v49 }
 0x241   :  { %1782 = vtanh.f32 %v258_v51 }
 0x24b   :  { %v1783_v52 = vpop.eup %1782 }
 0x24c   :  { %261 = vrot.lane.b32.xlu0 %v1783_v52, %s1954_s24 }
 0x2be   :  { %v262_v53 = vpop.permute.xlu0 %261 }
 0x2bf   :  { %v264_v54 = vmul.f32 %v1781_v45, %v262_v53 }
 0x2c1   :  { %266 = vrot.lane.b32.xlu1 %v264_v54, %s1952_s23 }
 0x333   :  { %v267_v55 = vpop.permute.xlu1 %266 }
 0x334   :  { %v269_v56 = vsel %vm160_vm2, %v267_v55, %v158_v31 }
 0x335   :  { %1565 = vmatmul.mubr.msk.f32.vlgmr.msra.gmra.mrb[2].mxu0 %vm162_vm3, %v269_v56 }
 0x336   :  { %1668 = vmatpush1.bf16.msra.mxu0 %v2040_v7  ;;  %628 = vmatprep.mubr.f32.mxu0 %v1953_v11 }
 0x337   :  { %1670 = vmatprep.subr.bf16.mxu0 %v2053_v12 }
 0x33a   :  { %1672 = vmatpush1.bf16.msra.mxu0 %v2062_v15 }
 0x33b   :  { %1674 = vmatprep.subr.bf16.mxu0 %v2071_v18 }
 0x33e   :  { %1676 = vmatpush1.bf16.msra.mxu0 %v2097_v25 }
 0x33f   :  { %1678 = vmatprep.subr.bf16.mxu0 %v2101_v26 }
 0x342   :  { %1680 = vmatpush1.bf16.msra.mxu0 %v2113_v29 }
 0x343   :  { %1698 = vmatprep.subr.bf16.mxu0 %v2029_v3 }
 0x408   :  { %v339_v59 = vpop.f32.mrb[2].mxu0 }
 0x409   :  { %v347_v60 = vadd.f32 %v345_v57, %v339_v59  ;;  %v341_v61 = vpop.f32.mrb[3].mxu0 }
 0x40a   :  { %v378_v62 = vadd.f32 %v2165_v58, %v341_v61 }
 0x40b   :  { %1784 = vtanh.f32 %v347_v60  ;;  %v1566_v2 = vmul.f32 -1.442695, %v347_v60 }
 0x40c   :  { %1786 = vtanh.f32 %v378_v62  ;;  %v1568_v4 = vmul.f32 -1.442695, %v378_v62 }
 0x40d   :  { %1788 = vpow2.f32 %v1566_v2 }
 0x40e   :  { %1790 = vpow2.f32 %v1568_v4 }
 0x415   :  { %v1785_v63 = vpop.eup %1784 }
 0x416   :  { %v1787_v0 = vpop.eup %1786  ;;  %357 = vrot.lane.b32.xlu0 %v1785_v63, %s1954_s24 }
 0x417   :  { %392 = vrot.lane.b32.xlu1 %v1787_v0, %s1954_s24  ;;  %v1789_v5 = vpop.eup %1788 }
 0x418   :  { %v1791_v6 = vpop.eup %1790  ;;  %v351_v8 = vadd.f32 1.0, %v1789_v5 }
 0x419   :  { %v382_v9 = vadd.f32 1.0, %v1791_v6 }
 0x41a   :  { %387 = vrot.lane.b32.xlu0 %v1562_v1, %s1952_s23  ;;  %1792 = vrcp.f32 %v351_v8 }
 0x41b   :  { %1794 = vrcp.f32 %v382_v9 }
 0x424   :  { %v1793_v10 = vpop.eup %1792 }
 0x425   :  { %v1795_v14 = vpop.eup %1794  ;;  %v355_v21 = vmul.f32 %v1793_v10, %v258_v51 }
 0x488   :  { %v358_v13 = vpop.permute.xlu0 %357 }
 0x489   :  { %v360_v16 = vmul.f32 %v1793_v10, %v358_v13  ;;  %v393_v17 = vpop.permute.xlu1 %392 }
 0x48a   :  { %v395_v19 = vmul.f32 %v1795_v14, %v393_v17  ;;  %v635_v17 = vrot.slane %v2143_v37, 6 }
 0x48b   :  { %362 = vrot.lane.b32.xlu1 %v360_v16, %s1952_s23 }
 0x48c   :  { %397 = vrot.lane.b32.xlu0 %v395_v19, %s1952_s23  ;;  %v388_v20 = vpop.permute.xlu0 %387 }
 0x48d   :  { %v390_v22 = vmul.f32 %v1795_v14, %v388_v20 }
 0x4fd   :  { %v363_v23 = vpop.permute.xlu1 %362 }
 0x4fe   :  { %v365_v24 = vadd.f32 %v363_v23, %v355_v21  ;;  %v398_v27 = vpop.permute.xlu0 %397 }
 0x4ff   :  { %v400_v28 = vadd.f32 %v398_v27, %v390_v22 }
 0x500   :  { %1796 = vtanh.f32 %v365_v24 }
 0x501   :  { %1798 = vtanh.f32 %v400_v28 }
 0x50a   :  { %v1797_v30 = vpop.eup %1796 }
 0x50b   :  { %v1799_v31 = vpop.eup %1798  ;;  %368 = vrot.lane.b32.xlu1 %v1797_v30, %s1954_s24 }
 0x50c   :  { %403 = vrot.lane.b32.xlu0 %v1799_v31, %s1954_s24 }
 0x57d   :  { %v369_v32 = vpop.permute.xlu1 %368 }
 0x57e   :  { %v371_v33 = vmul.f32 %v1793_v10, %v369_v32  ;;  %v404_v34 = vpop.permute.xlu0 %403 }
 0x57f   :  { %v2178_v36 = vmul.f32 %v1795_v14, %v404_v34 }
 0x580   :  { %414 = vrot.lane.b32.xlu1 %v371_v33, %s1952_s23 }
 0x581   :  { %417 = vrot.lane.b32.xlu0 %v2178_v36, %s1954_s24 }
 0x5f2   :  { %v415_v38 = vpop.permute.xlu1 %414 }
 0x5f3   :  { %v418_v39 = vpop.permute.xlu0 %417 }
 0x5f4   :  { %v420_v40 = vsel %vm160_vm2, %v415_v38, %v418_v39 }
 0x5f5   :  { %1569 = vmatmul.mubr.msk.f32.vlgmr.msra.gmra.mrb[2].mxu1 %vm162_vm3, %v420_v40 }
 0x5f6   :  { %1684 = vmatpush1.bf16.msra.mxu1 %v2040_v7  ;;  %768 = vmatprep.mubr.f32.mxu1 %v1953_v11 }
 0x5f7   :  { %1686 = vmatprep.subr.bf16.mxu1 %v2053_v12 }
 0x5fa   :  { %1688 = vmatpush1.bf16.msra.mxu1 %v2062_v15 }
 0x5fb   :  { %1690 = vmatprep.subr.bf16.mxu1 %v2071_v18 }
 0x5fe   :  { %1692 = vmatpush1.bf16.msra.mxu1 %v2097_v25 }
 0x5ff   :  { %1694 = vmatprep.subr.bf16.mxu1 %v2101_v26 }
 0x602   :  { %1696 = vmatpush1.bf16.msra.mxu1 %v2113_v29 }
 0x603   :  { %1714 = vmatprep.subr.bf16.mxu1 %v2029_v3 }
 0x6c8   :  { %v490_v42 = vpop.f32.mrb[2].mxu1 }
 0x6c9   :  { %v497_v43 = vadd.f32 %v495_v41, %v490_v42  ;;  %v492_v44 = vpop.f32.mrb[3].mxu1 }
 0x6ca   :  { %v522_v45 = vadd.f32 %v2165_v58, %v492_v44 }
 0x6cb   :  { %1800 = vtanh.f32 %v497_v43  ;;  %v1570_v48 = vmul.f32 -1.442695, %v497_v43 }
 0x6cc   :  { %1802 = vtanh.f32 %v522_v45  ;;  %v1571_v49 = vmul.f32 -1.442695, %v522_v45 }
 0x6cd   :  { %1804 = vpow2.f32 %v1570_v48 }
 0x6ce   :  { %1806 = vpow2.f32 %v1571_v49 }
 0x6d5   :  { %v1801_v46 = vpop.eup %1800 }
 0x6d6   :  { %v1803_v47 = vpop.eup %1802  ;;  %507 = vrot.lane.b32.xlu1 %v1801_v46, %s1954_s24 }
 0x6d7   :  { %532 = vrot.lane.b32.xlu0 %v1803_v47, %s1954_s24  ;;  %v1805_v50 = vpop.eup %1804 }
 0x6d8   :  { %v1807_v51 = vpop.eup %1806  ;;  %v501_v52 = vadd.f32 1.0, %v1805_v50 }
 0x6d9   :  { %v526_v53 = vadd.f32 1.0, %v1807_v51 }
 0x6da   :  { %1808 = vrcp.f32 %v501_v52 }
 0x6db   :  { %1810 = vrcp.f32 %v526_v53 }
 0x6e4   :  { %v1809_v54 = vpop.eup %1808 }
 0x6e5   :  { %v1811_v56 = vpop.eup %1810  ;;  %v505_v61 = vmul.f32 %v1809_v54, %v365_v24 }
 0x6e6   :  { %v530_v63 = vmul.f32 %v1811_v56, %v400_v28 }
 0x748   :  { %v508_v55 = vpop.permute.xlu1 %507 }
 0x749   :  { %v510_v57 = vmul.f32 %v1809_v54, %v508_v55  ;;  %v533_v59 = vpop.permute.xlu0 %532 }
 0x74a   :  { %v535_v60 = vmul.f32 %v1811_v56, %v533_v59 }
 0x74b   :  { %512 = vrot.lane.b32.xlu1 %v510_v57, %s1952_s23 }
 0x74c   :  { %537 = vrot.lane.b32.xlu0 %v535_v60, %s1952_s23 }
 0x7bd   :  { %v513_v62 = vpop.permute.xlu1 %512 }
 0x7be   :  { %v515_v0 = vadd.f32 %v513_v62, %v505_v61  ;;  %v538_v1 = vpop.permute.xlu0 %537 }
 0x7bf   :  { %v540_v2 = vadd.f32 %v538_v1, %v530_v63 }
 0x7c0   :  { %1812 = vtanh.f32 %v515_v0 }
 0x7c1   :  { %1814 = vtanh.f32 %v540_v2 }
 0x7ca   :  { %v1813_v4 = vpop.eup %1812 }
 0x7cb   :  { %v1815_v5 = vpop.eup %1814  ;;  %518 = vrot.lane.b32.xlu1 %v1813_v4, %s1954_s24 }
 0x7cc   :  { %543 = vrot.lane.b32.xlu0 %v1815_v5, %s1954_s24 }
 0x83d   :  { %v519_v6 = vpop.permute.xlu1 %518 }
 0x83e   :  { %v521_v8 = vmul.f32 %v1809_v54, %v519_v6  ;;  %v544_v9 = vpop.permute.xlu0 %543 }
 0x83f   :  { %v2202_v10 = vmul.f32 %v1811_v56, %v544_v9 }
 0x840   :  { %554 = vrot.lane.b32.xlu1 %v521_v8, %s1952_s23 }
 0x841   :  { %557 = vrot.lane.b32.xlu0 %v2202_v10, %s1954_s24 }
 0x8b2   :  { %v555_v13 = vpop.permute.xlu1 %554 }
 0x8b3   :  { %v558_v14 = vpop.permute.xlu0 %557 }
 0x8b4   :  { %v560_v16 = vsel %vm160_vm2, %v555_v13, %v558_v14 }
 0x8b5   :  { %1572 = vmatmul.mubr.msk.f32.vlgmr.msra.gmra.mrb[4].mxu0 %vm162_vm3, %v560_v16 }
 0x8b6   :  { %1700 = vmatpush1.bf16.msra.mxu0 %v2040_v7  ;;  %906 = vmatprep.mubr.f32.mxu0 %v1953_v11 }
 0x8b7   :  { %1702 = vmatprep.subr.bf16.mxu0 %v2053_v12 }
 0x8ba   :  { %1704 = vmatpush1.bf16.msra.mxu0 %v2062_v15 }
 0x8bb   :  { %1706 = vmatprep.subr.bf16.mxu0 %v2071_v18 }
 0x8be   :  { %1708 = vmatpush1.bf16.msra.mxu0 %v2097_v25 }
 0x8bf   :  { %1710 = vmatprep.subr.bf16.mxu0 %v2101_v26 }
 0x8c2   :  { %1712 = vmatpush1.bf16.msra.mxu0 %v2113_v29 }
 0x8c3   :  { %1730 = vmatprep.subr.bf16.mxu0 %v2029_v3 }
 0x988   :  { %v630_v19 = vpop.f32.mrb[4].mxu0 }
 0x989   :  { %v637_v20 = vadd.f32 %v635_v17, %v630_v19  ;;  %v632_v21 = vpop.f32.mrb[5].mxu0 }
 0x98a   :  { %v662_v22 = vadd.f32 %v2165_v58, %v632_v21 }
 0x98b   :  { %1816 = vtanh.f32 %v637_v20  ;;  %v1573_v27 = vmul.f32 -1.442695, %v637_v20 }
 0x98c   :  { %1818 = vtanh.f32 %v662_v22  ;;  %v1574_v28 = vmul.f32 -1.442695, %v662_v22 }
 0x98d   :  { %1820 = vpow2.f32 %v1573_v27 }
 0x98e   :  { %1822 = vpow2.f32 %v1574_v28 }
 0x995   :  { %v1817_v23 = vpop.eup %1816 }
 0x996   :  { %v1819_v24 = vpop.eup %1818  ;;  %647 = vrot.lane.b32.xlu1 %v1817_v23, %s1954_s24 }
 0x997   :  { %672 = vrot.lane.b32.xlu0 %v1819_v24, %s1954_s24  ;;  %v1821_v30 = vpop.eup %1820 }
 0x998   :  { %v1823_v31 = vpop.eup %1822  ;;  %v641_v37 = vadd.f32 1.0, %v1821_v30 }
 0x999   :  { %v666_v32 = vadd.f32 1.0, %v1823_v31 }
 0x99a   :  { %1824 = vrcp.f32 %v641_v37 }
 0x99b   :  { %1826 = vrcp.f32 %v666_v32 }
 0x9a4   :  { %v1825_v33 = vpop.eup %1824 }
 0x9a5   :  { %v1827_v38 = vpop.eup %1826  ;;  %v645_v42 = vmul.f32 %v1825_v33, %v515_v0 }
 0x9a6   :  { %v670_v44 = vmul.f32 %v1827_v38, %v540_v2 }
 0xa08   :  { %v648_v34 = vpop.permute.xlu1 %647 }
 0xa09   :  { %v650_v39 = vmul.f32 %v1825_v33, %v648_v34  ;;  %v673_v40 = vpop.permute.xlu0 %672 }
 0xa0a   :  { %v675_v41 = vmul.f32 %v1827_v38, %v673_v40 }
 0xa0b   :  { %652 = vrot.lane.b32.xlu1 %v650_v39, %s1952_s23 }
 0xa0c   :  { %677 = vrot.lane.b32.xlu0 %v675_v41, %s1952_s23 }
 0xa7d   :  { %v653_v43 = vpop.permute.xlu1 %652 }
 0xa7e   :  { %v655_v45 = vadd.f32 %v653_v43, %v645_v42  ;;  %v678_v46 = vpop.permute.xlu0 %677 }
 0xa7f   :  { %v680_v47 = vadd.f32 %v678_v46, %v670_v44 }
 0xa80   :  { %1828 = vtanh.f32 %v655_v45 }
 0xa81   :  { %1830 = vtanh.f32 %v680_v47 }
 0xa8a   :  { %v1829_v48 = vpop.eup %1828 }
 0xa8b   :  { %v1831_v49 = vpop.eup %1830  ;;  %658 = vrot.lane.b32.xlu1 %v1829_v48, %s1954_s24 }
 0xa8c   :  { %683 = vrot.lane.b32.xlu0 %v1831_v49, %s1954_s24 }
 0xafd   :  { %v659_v50 = vpop.permute.xlu1 %658 }
 0xafe   :  { %v661_v51 = vmul.f32 %v1825_v33, %v659_v50  ;;  %v684_v52 = vpop.permute.xlu0 %683 }
 0xaff   :  { %v2226_v53 = vmul.f32 %v1827_v38, %v684_v52  ;;  %v914_v38 = vrot.slane %v2141_v35, 2 }
 0xb00   :  { %694 = vrot.lane.b32.xlu1 %v661_v51, %s1952_s23 }
 0xb01   :  { %697 = vrot.lane.b32.xlu0 %v2226_v53, %s1954_s24 }
 0xb72   :  { %v695_v54 = vpop.permute.xlu1 %694 }
 0xb73   :  { %v698_v55 = vpop.permute.xlu0 %697 }
 0xb74   :  { %v700_v56 = vsel %vm160_vm2, %v695_v54, %v698_v55 }
 0xb75   :  { %1575 = vmatmul.mubr.msk.f32.vlgmr.msra.gmra.mrb[4].mxu1 %vm162_vm3, %v700_v56 }
 0xb76   :  { %1716 = vmatpush1.bf16.msra.mxu1 %v2040_v7  ;;  %1047 = vmatprep.mubr.f32.mxu1 %v1953_v11 }
 0xb77   :  { %1718 = vmatprep.subr.bf16.mxu1 %v2053_v12 }
 0xb7a   :  { %1720 = vmatpush1.bf16.msra.mxu1 %v2062_v15 }
 0xb7b   :  { %1722 = vmatprep.subr.bf16.mxu1 %v2071_v18 }
 0xb7e   :  { %1724 = vmatpush1.bf16.msra.mxu1 %v2097_v25 }
 0xb7f   :  { %1726 = vmatprep.subr.bf16.mxu1 %v2101_v26 }
 0xb82   :  { %1728 = vmatpush1.bf16.msra.mxu1 %v2113_v29 }
 0xb83   :  { %1746 = vmatprep.subr.bf16.mxu1 %v2029_v3 }
 0xc48   :  { %v770_v57 = vpop.f32.mrb[4].mxu1 }
 0xc49   :  { %v775_v59 = vadd.f32 %v770_v57, %v2141_v35  ;;  %v772_v60 = vpop.f32.mrb[5].mxu1 }
 0xc4a   :  { %v800_v61 = vadd.f32 %v2165_v58, %v772_v60 }
 0xc4b   :  { %1832 = vtanh.f32 %v775_v59  ;;  %v1576_v0 = vmul.f32 -1.442695, %v775_v59 }
 0xc4c   :  { %1834 = vtanh.f32 %v800_v61  ;;  %v1577_v1 = vmul.f32 -1.442695, %v800_v61 }
 0xc4d   :  { %1836 = vpow2.f32 %v1576_v0 }
 0xc4e   :  { %1838 = vpow2.f32 %v1577_v1 }
 0xc55   :  { %v1833_v62 = vpop.eup %1832 }
 0xc56   :  { %v1835_v63 = vpop.eup %1834  ;;  %785 = vrot.lane.b32.xlu1 %v1833_v62, %s1954_s24 }
 0xc57   :  { %810 = vrot.lane.b32.xlu0 %v1835_v63, %s1954_s24  ;;  %v1837_v2 = vpop.eup %1836 }
 0xc58   :  { %v1839_v3 = vpop.eup %1838  ;;  %v779_v4 = vadd.f32 1.0, %v1837_v2 }
 0xc59   :  { %v804_v5 = vadd.f32 1.0, %v1839_v3 }
 0xc5a   :  { %1840 = vrcp.f32 %v779_v4 }
 0xc5b   :  { %1842 = vrcp.f32 %v804_v5 }
 0xc64   :  { %v1841_v6 = vpop.eup %1840 }
 0xc65   :  { %v1843_v9 = vpop.eup %1842  ;;  %v783_v17 = vmul.f32 %v1841_v6, %v655_v45 }
 0xc66   :  { %v808_v20 = vmul.f32 %v1843_v9, %v680_v47 }
 0xcc8   :  { %v786_v8 = vpop.permute.xlu1 %785 }
 0xcc9   :  { %v788_v13 = vmul.f32 %v1841_v6, %v786_v8  ;;  %v811_v14 = vpop.permute.xlu0 %810 }
 0xcca   :  { %v813_v16 = vmul.f32 %v1843_v9, %v811_v14  ;;  %v1054_v14 = vrot.slane %v2141_v35, 4 }
 0xccb   :  { %790 = vrot.lane.b32.xlu1 %v788_v13, %s1952_s23 }
 0xccc   :  { %815 = vrot.lane.b32.xlu0 %v813_v16, %s1952_s23 }
 0xd3d   :  { %v791_v19 = vpop.permute.xlu1 %790 }
 0xd3e   :  { %v793_v21 = vadd.f32 %v791_v19, %v783_v17  ;;  %v816_v22 = vpop.permute.xlu0 %815 }
 0xd3f   :  { %v818_v23 = vadd.f32 %v816_v22, %v808_v20 }
 0xd40   :  { %1844 = vtanh.f32 %v793_v21 }
 0xd41   :  { %1846 = vtanh.f32 %v818_v23 }
 0xd4a   :  { %v1845_v24 = vpop.eup %1844 }
 0xd4b   :  { %v1847_v27 = vpop.eup %1846  ;;  %796 = vrot.lane.b32.xlu1 %v1845_v24, %s1954_s24 }
 0xd4c   :  { %821 = vrot.lane.b32.xlu0 %v1847_v27, %s1954_s24 }
 0xdbd   :  { %v797_v28 = vpop.permute.xlu1 %796 }
 0xdbe   :  { %v799_v30 = vmul.f32 %v1841_v6, %v797_v28  ;;  %v822_v31 = vpop.permute.xlu0 %821 }
 0xdbf   :  { %v2250_v37 = vmul.f32 %v1843_v9, %v822_v31 }
 0xdc0   :  { %832 = vrot.lane.b32.xlu1 %v799_v30, %s1952_s23 }
 0xdc1   :  { %835 = vrot.lane.b32.xlu0 %v2250_v37, %s1954_s24 }
 0xe32   :  { %v833_v32 = vpop.permute.xlu1 %832 }
 0xe33   :  { %v836_v33 = vpop.permute.xlu0 %835 }
 0xe34   :  { %v838_v34 = vsel %vm160_vm2, %v833_v32, %v836_v33 }
 0xe35   :  { %1578 = vmatmul.mubr.msk.f32.vlgmr.msra.gmra.mrb[6].mxu0 %vm162_vm3, %v838_v34 }
 0xe36   :  { %1732 = vmatpush1.bf16.msra.mxu0 %v2040_v7  ;;  %1187 = vmatprep.mubr.f32.mxu0 %v1953_v11 }
 0xe37   :  { %1734 = vmatprep.subr.bf16.mxu0 %v2053_v12 }
 0xe3a   :  { %1736 = vmatpush1.bf16.msra.mxu0 %v2062_v15 }
 0xe3b   :  { %1738 = vmatprep.subr.bf16.mxu0 %v2071_v18 }
 0xe3e   :  { %1740 = vmatpush1.bf16.msra.mxu0 %v2097_v25 }
 0xe3f   :  { %1742 = vmatprep.subr.bf16.mxu0 %v2101_v26 }
 0xe42   :  { %1744 = vmatpush1.bf16.msra.mxu0 %v2113_v29 }
 0xf08   :  { %v908_v39 = vpop.f32.mrb[6].mxu0 }
 0xf09   :  { %v916_v40 = vadd.f32 %v914_v38, %v908_v39  ;;  %v910_v41 = vpop.f32.mrb[7].mxu0 }
 0xf0a   :  { %v941_v42 = vadd.f32 %v2165_v58, %v910_v41 }
 0xf0b   :  { %1848 = vtanh.f32 %v916_v40  ;;  %v1579_v45 = vmul.f32 -1.442695, %v916_v40 }
 0xf0c   :  { %1850 = vtanh.f32 %v941_v42  ;;  %v1580_v46 = vmul.f32 -1.442695, %v941_v42 }
 0xf0d   :  { %1852 = vpow2.f32 %v1579_v45 }
 0xf0e   :  { %1854 = vpow2.f32 %v1580_v46 }
 0xf15   :  { %v1849_v43 = vpop.eup %1848 }
 0xf16   :  { %v1851_v44 = vpop.eup %1850  ;;  %926 = vrot.lane.b32.xlu1 %v1849_v43, %s1954_s24 }
 0xf17   :  { %951 = vrot.lane.b32.xlu0 %v1851_v44, %s1954_s24  ;;  %v1853_v47 = vpop.eup %1852 }
 0xf18   :  { %v1855_v48 = vpop.eup %1854  ;;  %v920_v49 = vadd.f32 1.0, %v1853_v47 }
 0xf19   :  { %v945_v50 = vadd.f32 1.0, %v1855_v48  ;;  %v1194_v48 = vrot.slane %v2141_v35, 6 }
 0xf1a   :  { %1856 = vrcp.f32 %v920_v49 }
 0xf1b   :  { %1858 = vrcp.f32 %v945_v50 }
 0xf24   :  { %v1857_v51 = vpop.eup %1856 }
 0xf25   :  { %v1859_v54 = vpop.eup %1858  ;;  %v924_v59 = vmul.f32 %v1857_v51, %v793_v21 }
 0xf26   :  { %v949_v61 = vmul.f32 %v1859_v54, %v818_v23 }
 0xf88   :  { %v927_v52 = vpop.permute.xlu1 %926 }
 0xf89   :  { %v929_v55 = vmul.f32 %v1857_v51, %v927_v52  ;;  %v952_v56 = vpop.permute.xlu0 %951 }
 0xf8a   :  { %v954_v57 = vmul.f32 %v1859_v54, %v952_v56 }
 0xf8b   :  { %931 = vrot.lane.b32.xlu1 %v929_v55, %s1952_s23 }
 0xf8c   :  { %956 = vrot.lane.b32.xlu0 %v954_v57, %s1952_s23 }
 0xffd   :  { %v932_v60 = vpop.permute.xlu1 %931 }
 0xffe   :  { %v934_v62 = vadd.f32 %v932_v60, %v924_v59  ;;  %v957_v63 = vpop.permute.xlu0 %956 }
 0xfff   :  { %v959_v0 = vadd.f32 %v957_v63, %v949_v61 }
0x1000   :  { %1860 = vtanh.f32 %v934_v62 }
0x1001   :  { %1862 = vtanh.f32 %v959_v0 }
0x100a   :  { %v1861_v1 = vpop.eup %1860 }
0x100b   :  { %v1863_v2 = vpop.eup %1862  ;;  %937 = vrot.lane.b32.xlu1 %v1861_v1, %s1954_s24 }
0x100c   :  { %962 = vrot.lane.b32.xlu0 %v1863_v2, %s1954_s24 }
0x107d   :  { %v938_v3 = vpop.permute.xlu1 %937 }
0x107e   :  { %v940_v4 = vmul.f32 %v1857_v51, %v938_v3  ;;  %v963_v5 = vpop.permute.xlu0 %962 }
0x107f   :  { %v2273_v6 = vmul.f32 %v1859_v54, %v963_v5 }
0x1080   :  { %973 = vrot.lane.b32.xlu1 %v940_v4, %s1952_s23 }
0x1081   :  { %976 = vrot.lane.b32.xlu0 %v2273_v6, %s1954_s24 }
0x10f2   :  { %v974_v8 = vpop.permute.xlu1 %973 }
0x10f3   :  { %v977_v9 = vpop.permute.xlu0 %976 }
0x10f4   :  { %v979_v13 = vsel %vm160_vm2, %v974_v8, %v977_v9 }
0x10f5   :  { %1581 = vmatmul.mubr.msk.f32.vlgmr.msra.gmra.mrb[6].mxu1 %vm162_vm3, %v979_v13 }
0x10f6   :  { %1748 = vmatpush1.bf16.msra.mxu1 %v2040_v7  ;;  %1327 = vmatprep.mubr.f32.mxu1 %v1953_v11 }
0x10f7   :  { %1750 = vmatprep.subr.bf16.mxu1 %v2053_v12 }
0x10fa   :  { %1752 = vmatpush1.bf16.msra.mxu1 %v2062_v15 }
0x10fb   :  { %1754 = vmatprep.subr.bf16.mxu1 %v2071_v18 }
0x10fe   :  { %1756 = vmatpush1.bf16.msra.mxu1 %v2097_v25 }
0x10ff   :  { %1758 = vmatprep.subr.bf16.mxu1 %v2101_v26 }
0x1102   :  { %1760 = vmatpush1.bf16.msra.mxu1 %v2113_v29 }
0x11c8   :  { %v1049_v16 = vpop.f32.mrb[6].mxu1 }
0x11c9   :  { %v1056_v17 = vadd.f32 %v1054_v14, %v1049_v16  ;;  %v1051_v19 = vpop.f32.mrb[7].mxu1 }
0x11ca   :  { %v1081_v7 = vadd.f32 %v2165_v58, %v1051_v19 }
0x11cb   :  { %1864 = vtanh.f32 %v1056_v17  ;;  %v1582_v15 = vmul.f32 -1.442695, %v1056_v17 }
0x11cc   :  { %1866 = vtanh.f32 %v1081_v7  ;;  %v1583_v18 = vmul.f32 -1.442695, %v1081_v7 }
0x11cd   :  { %1868 = vpow2.f32 %v1582_v15 }
0x11ce   :  { %1870 = vpow2.f32 %v1583_v18 }
0x11d5   :  { %v1865_v11 = vpop.eup %1864 }
0x11d6   :  { %v1867_v12 = vpop.eup %1866  ;;  %1066 = vrot.lane.b32.xlu1 %v1865_v11, %s1954_s24 }
0x11d7   :  { %1091 = vrot.lane.b32.xlu0 %v1867_v12, %s1954_s24  ;;  %v1869_v25 = vpop.eup %1868 }
0x11d8   :  { %v1871_v26 = vpop.eup %1870  ;;  %v1060_v29 = vadd.f32 1.0, %v1869_v25 }
0x11d9   :  { %v1085_v20 = vadd.f32 1.0, %v1871_v26 }
0x11da   :  { %1872 = vrcp.f32 %v1060_v29 }
0x11db   :  { %1874 = vrcp.f32 %v1085_v20 }
0x11e4   :  { %v1873_v21 = vpop.eup %1872 }
0x11e5   :  { %v1875_v23 = vpop.eup %1874  ;;  %v1064_v30 = vmul.f32 %v1873_v21, %v934_v62 }
0x11e6   :  { %v1089_v32 = vmul.f32 %v1875_v23, %v959_v0 }
0x1248   :  { %v1067_v22 = vpop.permute.xlu1 %1066 }
0x1249   :  { %v1069_v24 = vmul.f32 %v1873_v21, %v1067_v22  ;;  %v1092_v27 = vpop.permute.xlu0 %1091 }
0x124a   :  { %v1094_v28 = vmul.f32 %v1875_v23, %v1092_v27 }
0x124b   :  { %1071 = vrot.lane.b32.xlu1 %v1069_v24, %s1952_s23 }
0x124c   :  { %1096 = vrot.lane.b32.xlu0 %v1094_v28, %s1952_s23 }
0x12bd   :  { %v1072_v31 = vpop.permute.xlu1 %1071 }
0x12be   :  { %v1074_v33 = vadd.f32 %v1072_v31, %v1064_v30  ;;  %v1097_v34 = vpop.permute.xlu0 %1096 }
0x12bf   :  { %v1099_v38 = vadd.f32 %v1097_v34, %v1089_v32 }
0x12c0   :  { %1876 = vtanh.f32 %v1074_v33 }
0x12c1   :  { %1878 = vtanh.f32 %v1099_v38 }
0x12ca   :  { %v1877_v39 = vpop.eup %1876 }
0x12cb   :  { %v1879_v40 = vpop.eup %1878  ;;  %1077 = vrot.lane.b32.xlu1 %v1877_v39, %s1954_s24  ;;  %v1429_v39 = vld [vmem:[%s2407_s7] sm:$0xff] }
0x12cc   :  { %1102 = vrot.lane.b32.xlu0 %v1879_v40, %s1954_s24  ;;  %v1430_v40 = vld [vmem:[%s2407_s7 + $0x8] sm:$0xff] }
0x133d   :  { %v1078_v41 = vpop.permute.xlu1 %1077 }
0x133e   :  { %v1080_v42 = vmul.f32 %v1873_v21, %v1078_v41  ;;  %v1103_v43 = vpop.permute.xlu0 %1102  ;;  %v1761_v41 = vpack.c.bf16 %v1430_v40, %v1429_v39 }
0x133f   :  { %v2296_v44 = vmul.f32 %v1875_v23, %v1103_v43 }
0x1340   :  { %1113 = vrot.lane.b32.xlu1 %v1080_v42, %s1952_s23  ;;  %1762 = vmatprep.subr.bf16.mxu0 %v1761_v41 }
0x1341   :  { %1116 = vrot.lane.b32.xlu0 %v2296_v44, %s1954_s24 }
0x13b2   :  { %v1114_v45 = vpop.permute.xlu1 %1113 }
0x13b3   :  { %v1117_v46 = vpop.permute.xlu0 %1116 }
0x13b4   :  { %v1119_v47 = vsel %vm160_vm2, %v1114_v45, %v1117_v46 }
0x13b5   :  { %1584 = vmatmul.mubr.msk.f32.vlgmr.msra.gmra.mrb[8].mxu0 %vm162_vm3, %v1119_v47 }
0x13b6   :  { %1764 = vmatpush3.bf16.msra.mxu0 %v1761_v41 }
0x1488   :  { %v1189_v49 = vpop.f32.mrb[8].mxu0 }
0x1489   :  { %v1196_v50 = vadd.f32 %v1194_v48, %v1189_v49  ;;  %v1191_v51 = vpop.f32.mrb[9].mxu0 }
0x148a   :  { %v1221_v52 = vadd.f32 %v2165_v58, %v1191_v51 }
0x148b   :  { %1880 = vtanh.f32 %v1196_v50  ;;  %v1585_v56 = vmul.f32 -1.442695, %v1196_v50 }
0x148c   :  { %1882 = vtanh.f32 %v1221_v52  ;;  %v1586_v57 = vmul.f32 -1.442695, %v1221_v52 }
0x148d   :  { %1884 = vpow2.f32 %v1585_v56 }
0x148e   :  { %1886 = vpow2.f32 %v1586_v57 }
0x1495   :  { %v1881_v54 = vpop.eup %1880 }
0x1496   :  { %v1883_v55 = vpop.eup %1882  ;;  %1206 = vrot.lane.b32.xlu1 %v1881_v54, %s1954_s24 }
0x1497   :  { %1231 = vrot.lane.b32.xlu0 %v1883_v55, %s1954_s24  ;;  %v1885_v59 = vpop.eup %1884 }
0x1498   :  { %v1887_v60 = vpop.eup %1886  ;;  %v1200_v35 = vadd.f32 1.0, %v1885_v59 }
0x1499   :  { %v1225_v61 = vadd.f32 1.0, %v1887_v60 }
0x149a   :  { %1888 = vrcp.f32 %v1200_v35 }
0x149b   :  { %1890 = vrcp.f32 %v1225_v61 }
0x14a4   :  { %v1889_v62 = vpop.eup %1888 }
0x14a5   :  { %v1891_v0 = vpop.eup %1890  ;;  %v1204_v4 = vmul.f32 %v1889_v62, %v1074_v33 }
0x14a6   :  { %v1229_v8 = vmul.f32 %v1891_v0, %v1099_v38 }
0x1508   :  { %v1207_v63 = vpop.permute.xlu1 %1206 }
0x1509   :  { %v1209_v1 = vmul.f32 %v1889_v62, %v1207_v63  ;;  %v1232_v2 = vpop.permute.xlu0 %1231 }
0x150a   :  { %v1234_v3 = vmul.f32 %v1891_v0, %v1232_v2 }
0x150b   :  { %1211 = vrot.lane.b32.xlu1 %v1209_v1, %s1952_s23 }
0x150c   :  { %1236 = vrot.lane.b32.xlu0 %v1234_v3, %s1952_s23 }
0x157d   :  { %v1212_v5 = vpop.permute.xlu1 %1211 }
0x157e   :  { %v1214_v9 = vadd.f32 %v1212_v5, %v1204_v4  ;;  %v1237_v13 = vpop.permute.xlu0 %1236 }
0x157f   :  { %v1239_v14 = vadd.f32 %v1237_v13, %v1229_v8 }
0x1580   :  { %1892 = vtanh.f32 %v1214_v9 }
0x1581   :  { %1894 = vtanh.f32 %v1239_v14 }
0x158a   :  { %v1893_v16 = vpop.eup %1892 }
0x158b   :  { %v1895_v17 = vpop.eup %1894  ;;  %1217 = vrot.lane.b32.xlu1 %v1893_v16, %s1954_s24 }
0x158c   :  { %1242 = vrot.lane.b32.xlu0 %v1895_v17, %s1954_s24 }
0x15fd   :  { %v1218_v19 = vpop.permute.xlu1 %1217 }
0x15fe   :  { %v1220_v7 = vmul.f32 %v1889_v62, %v1218_v19  ;;  %v1243_v11 = vpop.permute.xlu0 %1242 }
0x15ff   :  { %v1245_v12 = vmul.f32 %v1891_v0, %v1243_v11 }
0x1600   :  { %1253 = vrot.lane.b32.xlu1 %v1220_v7, %s1952_s23 }
0x1601   :  { %1256 = vrot.lane.b32.xlu0 %v1245_v12, %s1954_s24 }
0x1672   :  { %v1254_v15 = vpop.permute.xlu1 %1253 }
0x1673   :  { %1364 = vst.msk [vmem:[#allocation3] sm:$0x3] %vm411_vm4, %v1254_v15  ;;  %v1257_v18 = vpop.permute.xlu0 %1256 }
0x1674   :  { %v1259_v25 = vsel %vm160_vm2, %v1254_v15, %v1257_v18 }
0x1675   :  { %1587 = vmatmul.mubr.msk.f32.vlgmr.msra.gmra.mrb[8].mxu1 %vm162_vm3, %v1259_v25 }
0x1748   :  { %v1329_v26 = vpop.f32.mrb[8].mxu1 }
0x1749   :  { %v1330_v29 = vpop.f32.mrb[9].mxu1 }
0x174a   :  { %v1333_v20 = vadd.f32 %v2165_v58, %v1330_v29 }
0x174c   :  { %1896 = vtanh.f32 %v1333_v20  ;;  %v1588_v22 = vmul.f32 -1.442695, %v1333_v20 }
0x174e   :  { %1898 = vpow2.f32 %v1588_v22 }
0x1756   :  { %v1897_v21 = vpop.eup %1896 }
0x1757   :  { %1343 = vrot.lane.b32.xlu1 %v1897_v21, %s1954_s24 }
0x1758   :  { %v1899_v23 = vpop.eup %1898 }
0x1759   :  { %v1337_v24 = vadd.f32 1.0, %v1899_v23 }
0x175b   :  { %1900 = vrcp.f32 %v1337_v24 }
0x1765   :  { %v1901_v27 = vpop.eup %1900 }
0x1766   :  { %v1341_v58 = vmul.f32 %v1901_v27, %v1239_v14 }
0x17c9   :  { %v1344_v28 = vpop.permute.xlu1 %1343 }
0x17ca   :  { %v1346_v30 = vmul.f32 %v1901_v27, %v1344_v28 }
0x17cc   :  { %1348 = vrot.lane.b32.xlu0 %v1346_v30, %s1952_s23 }
0x17d0   :  { %548 = vrot.lane.b32.xlu0 %v2202_v10, %s1952_s23 }
0x17d4   :  { %688 = vrot.lane.b32.xlu0 %v2226_v53, %s1952_s23 }
0x17d8   :  { %967 = vrot.lane.b32.xlu0 %v2273_v6, %s1952_s23 }
0x17dc   :  { %1247 = vrot.lane.b32.xlu0 %v1245_v12, %s1952_s23 }
0x17e0   :  { %1366 = vrot.lane.b32.xlu0 %v1214_v9, %s1955_s2 }
0x183e   :  { %v1349_v31 = vpop.permute.xlu0 %1348 }
0x183f   :  { %v1351_v32 = vadd.f32 %v1349_v31, %v1341_v58 }
0x1841   :  { %1902 = vtanh.f32 %v1351_v32 }
0x1842   :  { %v549_v33 = vpop.permute.xlu0 %548 }
0x1843   :  { %552 = vst.msk [vmem:[#allocation2 + $0x2] sm:$0x3] %vm411_vm4, %v549_v33 }
0x1846   :  { %v689_v34 = vpop.permute.xlu0 %688 }
0x1847   :  { %692 = vst.msk [vmem:[#allocation2 + $0x4] sm:$0x3] %vm411_vm4, %v689_v34 }
0x184a   :  { %v968_v10 = vpop.permute.xlu0 %967  ;;  %v1379_v49 = vld [vmem:[#allocation2 + $0x2] sm:$0x3] }
0x184b   :  { %v1903_v53 = vpop.eup %1902  ;;  %971 = vst.msk [vmem:[#allocation2 + $0x8] sm:$0x3] %vm411_vm4, %v968_v10  ;;  %v1394_v54 = vrot.slane %v1379_v49, 7 }
0x184c   :  { %1354 = vrot.lane.b32.xlu1 %v1903_v53, %s1954_s24 }
0x184e   :  { %v1248_v6 = vpop.permute.xlu0 %1247  ;;  %v1380_v52 = vld [vmem:[#allocation2 + $0x4] sm:$0x3] }
0x184f   :  { %1251 = vst.msk [vmem:[#allocation2 + $0xc] sm:$0x3] %vm411_vm4, %v1248_v6  ;;  %v1397_v61 = vrot.slane %v1380_v52, 6  ;;  %v1417_v62 = vrot.slane %v1380_v52, 7 }
0x1850   :  { %408 = vrot.lane.b32.xlu1 %v2178_v36, %s1952_s23  ;;  %v1431_v36 = vld [vmem:[%s2407_s7 + $0x10] sm:$0xff] }
0x1852   :  { %v1367_v38 = vpop.permute.xlu0 %1366  ;;  %v1382_v63 = vld [vmem:[#allocation2 + $0x8] sm:$0x3] }
0x1853   :  { %1369 = vst.msk [vmem:[#allocation5] sm:$0x3] %vm411_vm4, %v1367_v38  ;;  %v1403_v9 = vrot.slane %v1382_v63, 4  ;;  %v1421_v13 = vrot.slane %v1382_v63, 5 }
0x1854   :  { %826 = vrot.lane.b32.xlu1 %v2250_v37, %s1952_s23  ;;  %v1432_v37 = vld [vmem:[%s2407_s7 + $0x18] sm:$0xff]  ;;  %s1956_s7 = smov [#allocation3]  }
0x1855   :  { %v1765_v42 = vpack.c.bf16 %v1432_v37, %v1431_v36  ;;  %s1528_s15 = sshll.u32 %s1956_s7, 4  ;;  %s1529_s15 = int_to_ptr.vmem [resolvable:$true] %s1528_s15 }
0x1856   :  { %v1384_v14 = vld [vmem:[#allocation2 + $0xc] sm:$0x3]  ;;  %s1904_s0 = scalar_lea.vmem %s1529_s15, 64  ;;  %p1909_p1 = scmp.lt.s32.totalorder %s1529_s15, %s1529_s15 }
0x1857   :  { %1766 = vmatprep.subr.bf16.mxu0 %v1765_v42  ;;  %v1409_v12 = vrot.slane %v1384_v14, 2  ;;  %v1425_v15 = vrot.slane %v1384_v14, 3  ;;  %p1905_p0 = scmp.ne.s32.totalorder %s1529_s15, %s1904_s0  ;;  %p1910_p2 = scmp.lt.s32.totalorder %s1904_s0, %s1904_s0 }
0x1858   :  { %1107 = vrot.lane.b32.xlu1 %v2296_v44, %s1952_s23  ;;  %1768 = vmatpush3.bf16.msra.mxu0 %v1765_v42 }
0x1859   :  { %p1911_p3 = por %p1910_p2, %p1909_p1 }
0x185b   :  { %p1912_p4 = pnand %p1911_p3, %p1905_p0 }
0x18be   :  { %v1355_v43 = vpop.permute.xlu1 %1354 }
0x18bf   :  { %v1357_v44 = vmul.f32 %v1901_v27, %v1355_v43 }
0x18c1   :  { %1359 = vrot.lane.b32.xlu1 %v1357_v44, %s1952_s23 }
0x18c2   :  { %v409_v45 = vpop.permute.xlu1 %408 }
0x18c3   :  { %412 = vst.msk [vmem:[#allocation2] sm:$0x3] %vm411_vm4, %v409_v45 }
0x18c5   :  { %1373 = vrot.lane.b32.xlu1 %v1351_v32, %s1955_s2 }
0x18c6   :  { %v827_v46 = vpop.permute.xlu1 %826 }
0x18c7   :  { %830 = vst.msk [vmem:[#allocation2 + $0x6] sm:$0x3] %vm411_vm4, %v827_v46 }
0x18ca   :  { %v1108_v47 = vpop.permute.xlu1 %1107  ;;  %v1378_v48 = vld [vmem:[#allocation2] sm:$0x3] }
0x18cb   :  { %1111 = vst.msk [vmem:[#allocation2 + $0xa] sm:$0x3] %vm411_vm4, %v1108_v47  ;;  %v1415_v50 = vrot.slane %v1378_v48, 1  ;;  %v1396_v55 = vsel %vm1395_vm5, %v1394_v54, %v1378_v48 }
0x18cc   :  { %v1399_v0 = vsel %vm1398_vm6, %v1397_v61, %v1396_v55 }
0x18cd   :  { %v1416_v59 = vsel %vm1395_vm5, %v1379_v49, %v1415_v50 }
0x18ce   :  { %v1381_v51 = vld [vmem:[#allocation2 + $0x6] sm:$0x3]  ;;  %v1418_v1 = vsel %vm1398_vm6, %v1417_v62, %v1416_v59 }
0x18cf   :  { %v1400_v56 = vrot.slane %v1381_v51, 5  ;;  %v1419_v57 = vrot.slane %v1381_v51, 6 }
0x18d1   :  { %v1402_v2 = vsel %vm1401_vm7, %v1400_v56, %v1399_v0  ;;  %v1420_v5 = vsel %vm1401_vm7, %v1419_v57, %v1418_v1 }
0x18d2   :  { %v1383_v35 = vld [vmem:[#allocation2 + $0xa] sm:$0x3]  ;;  %v1405_v16 = vsel %vm1404_vm8, %v1403_v9, %v1402_v2  ;;  %v1422_v17 = vsel %vm1404_vm8, %v1421_v13, %v1420_v5 }
0x18d3   :  { %v1406_v3 = vrot.slane %v1383_v35, 3  ;;  %v1423_v4 = vrot.slane %v1383_v35, 4 }
0x18d5   :  { %v1408_v19 = vsel %vm1407_vm9, %v1406_v3, %v1405_v16  ;;  %v1424_v7 = vsel %vm1407_vm9, %v1423_v4, %v1422_v17 }
0x18d6   :  { %v1411_v26 = vsel %vm1410_vm10, %v1409_v12, %v1408_v19  ;;  %v1426_v29 = vsel %vm1410_vm10, %v1425_v15, %v1424_v7 }
0x1933   :  { %v1360_v60 = vpop.permute.xlu1 %1359 }
0x1934   :  { %1363 = vst.msk [vmem:[#allocation2 + $0xe] sm:$0x3] %vm411_vm4, %v1360_v60  ;;  %1371 = vst.msk [vmem:[#allocation3 + $0x2] sm:$0x3] %vm411_vm4, %v1360_v60 }
0x1937   :  { %v1374_v8 = vpop.permute.xlu1 %1373 }
0x1938   :  { %1377 = vst.msk [vmem:[#allocation5 + $0x2] sm:$0x3] %vm411_vm4, %v1374_v8 }
0x193b   :  { %v1385_v11 = vld [vmem:[#allocation2 + $0xe] sm:$0x3] }
0x193c   :  { %v1412_v18 = vrot.slane %v1385_v11, 1  ;;  %v1427_v25 = vrot.slane %v1385_v11, 2 }
0x193e   :  { %v1414_v20 = vsel %vm1413_vm11, %v1412_v18, %v1411_v26  ;;  %v1428_v21 = vsel %vm1413_vm11, %v1427_v25, %v1426_v29 }
0x193f   :  { %1614 = vmatprep.mubr.msk.f32.mxu0 %vm160_vm2, %v1414_v20 }
0x1940   :  { %1615 = vmatmul.mubr.msk.f32.vlgmr.msra.gmra.mrb[10].mxu0 %vm160_vm2, %v1428_v21 }
0x1941   :  { %1915 = shalt.err (!%p1912_p4)
}
0x1942   :  { %s1916_s20 = scalar_lea.hbm %s2410_s10, 64 }
0x1943   :  { %p1917_p5 = scmp.ne.s32.totalorder %s2410_s10, %s1916_s20  ;;  %p1920_p6 = scmp.lt.u32.totalorder %s1916_s20, %s2410_s10 }
0x1945   :  { %p1922_p7 = pnand %p1920_p6, %p1917_p5 }
0x1947   :  { %1925 = shalt.err (!%p1922_p7)
}
0x1948   :  { %s1958_s24 = smov 2   ;;  %s1926_s26 = scalar_lea.vmem %s1541_s17, 64 }
0x1949   :  { %1534 = dma.vmem_to_hbm [thread:$0]  %s1529_s15, 64, %s2410_s10, [#allocation4], %s1952_s23, %s1952_s23, %s1958_s24  }
0x194a   :  { %p1927_p8 = scmp.ne.s32.totalorder %s1541_s17, %s1926_s26  ;;  %p1931_p9 = scmp.lt.s32.totalorder %s1541_s17, %s1541_s17 }
0x194b   :  { %p1932_p10 = scmp.lt.s32.totalorder %s1926_s26, %s1926_s26 }
0x194d   :  { %p1933_p11 = por %p1932_p10, %p1931_p9 }
0x194f   :  { %p1934_p12 = pnand %p1933_p11, %p1927_p8 }
0x1951   :  { %1937 = shalt.err (!%p1934_p12)
}
0x1952   :  { %s1938_s6 = scalar_lea.hbm %s2411_s11, 64 }
0x1953   :  { %p1939_p13 = scmp.ne.s32.totalorder %s2411_s11, %s1938_s6  ;;  %p1942_p0 = scmp.lt.u32.totalorder %s1938_s6, %s2411_s11 }
0x1955   :  { %p1944_p1 = pnand %p1942_p0, %p1939_p13 }
0x1957   :  { %1947 = shalt.err (!%p1944_p1)
}
0x1958   :  { %1546 = dma.vmem_to_hbm [thread:$0]  %s1541_s17, 64, %s2411_s11, [#allocation6], %s1952_s23, %s1952_s23, %s1958_s24  }
0x1959   :  { %v1589_v22 = vld [vmem:[%s2408_s8] ss:$0 sm:$0xff] }
0x1a13   :  { %v1616_v23 = vpop.f32.mrb[10].mxu0 }
0x1a14   :  { %v1516_v24 = vadd.f32 %v1616_v23, %v1589_v22  ;;  %v1510_v27 = vpop.f32.mrb[11].mxu0 }
0x1a15   :  { %v1511_v28 = vadd.f32 %v1589_v22, %v1510_v27 }
0x1a16   :  { %1520 = vst.msk [vmem:[%s2409_s9 + $0x8] sm:$0xff] %vm47_vm1, %v1516_v24 }
0x1a17   :  { %1519 = vst.msk [vmem:[%s2409_s9] sm:$0xff] %vm47_vm1, %v1511_v28 }
0x1a18   :  { %1948 = dma.done.wait [#allocation4], 64  }
0x1a19   :  { %1949 = vsyncadd [#allocation4], 4294967232 }
0x1a1a   :  { %1950 = dma.done.wait [#allocation6], 64  }
0x1a1b   :  { %1951 = vsyncadd [#allocation6], 4294967232 }
0x1a1c   :  { %1555 = vsyncpa [#allocation4], 1 }
0x1a1d   :  { %1556 = vsyncpa [#allocation6], 1 }

</bundles_post_ra>
